<compile_context>
chip_gen: v7x
topology: tpu7x:2x2x1
jax: 0.10.0
libtpu: 0.0.40
codegen_flags: <defaults>
</compile_context>

<pallas_src>
import jax
import jax.numpy as jnp
from jax.experimental import pallas as pl
from jax.experimental.pallas import tpu as pltpu


FUSED_PARAM_ORDER = [
    "w_xh_a", "b_xh_a", "wa2a", "ba2a", "wd2d_row", "w_r", "wproj", "bproj",
]


def lstm_soft_att_kernel(
    xh_ref, attf_ref, c_ref,
    wxha_ref, bxha_ref, wa2a_ref, ba2a_ref, wd2d_ref, wr_ref,
    wproj_ref, bproj_ref,
    state_ref, logsoft_ref):
  f32 = jnp.float32
  mxu_dtype = wxha_ref.dtype            # bf16 weights -> bf16 MXU operands

  prev_c = c_ref[...]                   # (TB, R) f32
  TB, R = prev_c.shape
  A = wa2a_ref.shape[1]
  G = 4 * R

  # ---- MXU push #1 (attention-independent, issued first so it overlaps the
  # VPU/EUP attention math): gate pre-sums from [x, prev_h] with h2a fused
  # into the trailing A columns (x-rows of those columns are zero).
  xh_out = jnp.dot(xh_ref[...], wxha_ref[...],
                   preferred_element_type=f32) + bxha_ref[...]           # (TB, 4R+A)
  sums_xh = xh_out[:, 0:G]                                               # (TB, 4R)
  att_h = xh_out[:, G:G + A]                                             # (TB, A)

  # ---- soft attention ----
  att_flat = attf_ref[...]              # (TB*A, R) bf16, pre-flattened on host
  att_v = jnp.dot(att_flat, wa2a_ref[...],
                  preferred_element_type=f32) + ba2a_ref[...]            # (TB*A, A)
  # A % 8 == 0 keeps these sublane splits tile-aligned (no VMEM relayout copy).
  att_v = att_v.reshape(TB, A, A)
  # TODO(synk): on v6e/v7x (bf16 EUP) this tanh block could run in bf16 if the
  # EUP slot binds at production sizes; kept f32 here (required on v5e).
  dot = jnp.tanh(att_h[:, :, None] + att_v)                              # (TB, A, A)
  # d2d as a weighted lane reduction; the d2d bias is dropped because softmax
  # is invariant to a constant shift of the scores.
  scores = jnp.sum(dot * wd2d_ref[...][None, :, :], axis=-1)             # (TB, A)

  # exact softmax over attention positions (f32)
  m = jnp.max(scores, axis=-1, keepdims=True)
  e = jnp.exp(scores - m)
  weight = e / jnp.sum(e, axis=-1, keepdims=True)                        # (TB, A)

  att3 = att_flat.reshape(TB, A, R)                                      # bf16, tile-aligned
  if A >= 32 or R >= 256:
    # Large attention: batched matmul on the (otherwise idle) MXU.
    att_res = jnp.einsum("ba,bar->br", weight.astype(mxu_dtype), att3,
                         preferred_element_type=f32)                     # (TB, R)
  else:
    # Small attention: VPU multiply + small sublane reduce, f32 accumulation.
    att_res = jnp.sum(weight[:, :, None] * att3.astype(f32), axis=1)     # (TB, R)

  # ---- MXU push #2: attention-dependent gate contribution ----
  sums = sums_xh + jnp.dot(att_res.astype(mxu_dtype), wr_ref[...],
                           preferred_element_type=f32)                   # (TB, 4R)

  # NOTE: at production sizes pad rnn_size / output_size to multiples of 128 so
  # these gate slices and the output stores are lane-dense (unmasked vst).
  in_gate = jax.nn.sigmoid(sums[:, 0:R])
  forget_gate = jax.nn.sigmoid(sums[:, R:2 * R])
  out_gate = jax.nn.sigmoid(sums[:, 2 * R:3 * R])
  in_transform = jnp.tanh(sums[:, 3 * R:4 * R])

  next_c = forget_gate * prev_c + in_gate * in_transform
  next_h = out_gate * jnp.tanh(next_c)
  # TODO(synk): training-mode F.dropout(next_h, p) omitted — dropout=0 /
  # inference semantics only.

  # ---- output projection + log_softmax ----
  # TODO(synk): for vocab-scale output_size, tile wproj along an extra grid
  # axis (TILE_O multiple of 128, two-pass log-softmax) and size TILE_O /
  # vmem_limit_bytes from pltpu.get_tpu_info().vmem_capacity_bytes (64 MiB on
  # v7x vs 128 MiB on v5e/v6e).
  logits = jnp.dot(next_h.astype(mxu_dtype), wproj_ref[...],
                   preferred_element_type=f32) + bproj_ref[...]          # (TB, O)
  lmax = jnp.max(logits, axis=-1, keepdims=True)
  lse = jnp.log(jnp.sum(jnp.exp(logits - lmax), axis=-1, keepdims=True)) + lmax
  logsoft = logits - lse

  # Single state slab (one writeback DMA): [next_c || next_h], split on host.
  state_ref[:, 0:R] = next_c
  state_ref[:, R:2 * R] = next_h
  logsoft_ref[...] = logsoft


def prepare_params(params, matmul_dtype=jnp.bfloat16):
  """Host-side fusion / re-layout of the PyTorch-style parameters.

  * wi2h / wh2h are concatenated row-wise into one (I+R, 4R) matrix, and wh2a
    is fused as A extra columns (zero rows for x) so a single MXU push yields
    both the attention-independent gate pre-sums and att_h.
  * wr2a stays separate so its matmul can run after attention (its bias is
    pre-summed into the gate bias — addition is order-free).
  * wd2d (A, 1) is transposed to a (1, A) lane row; bd2d is dropped (softmax
    shift invariance makes it a mathematical no-op).
  * MXU weight operands are stored bf16; biases stay f32.
  """
  I = params["wi2h"].shape[0]
  A = params["wa2a"].shape[1]
  w_xh = jnp.concatenate([params["wi2h"], params["wh2h"]], axis=0)        # (I+R, 4R)
  wh2a_pad = jnp.concatenate(
      [jnp.zeros((I, A), params["wh2a"].dtype), params["wh2a"]], axis=0)  # (I+R, A)
  w_xh_a = jnp.concatenate([w_xh, wh2a_pad], axis=1)                      # (I+R, 4R+A)
  b_gates = params["bi2h"] + params["bh2h"] + params["br2a"]              # (1, 4R)
  b_xh_a = jnp.concatenate([b_gates, params["bh2a"]], axis=1)             # (1, 4R+A)
  return {
      "w_xh_a": w_xh_a.astype(matmul_dtype),
      "b_xh_a": b_xh_a,                              # f32
      "wa2a": params["wa2a"].astype(matmul_dtype),
      "ba2a": params["ba2a"],
      "wd2d_row": params["wd2d"].T,                  # (1, A) lane row, f32 (VPU use)
      "w_r": params["wr2a"].astype(matmul_dtype),    # (R, 4R)
      "wproj": params["wproj"].astype(matmul_dtype),
      "bproj": params["bproj"],
  }


def lstm_soft_att(x, att, prev_c, prev_h, fused, *, block_b=None):
  """Single-timestep soft-attention LSTM cell.

  block_b: per-grid-step batch tile.  Default = full batch (no grid split):
  v5e/v6e have a single TensorCore, so splitting only adds per-step overhead
  and empties MXU pushes.  On v7x pass block_b explicitly (>= 64 rows and a
  multiple of 8, ideally 16 for bf16 sublane packing) once B is large enough
  to keep both TensorCores fed with full-ish M tiles.

  TODO(synk): if this cell is driven per-timestep by an outer scan, lift the
  time loop into a trailing 'arbitrary' grid axis with c/h carried in VMEM
  scratch so the weights stay resident and launch/DMA overhead amortizes over
  the whole sequence (largest remaining wall-clock win at these sizes).
  """
  B, I = x.shape
  _, A, R = att.shape
  O = fused["wproj"].shape[1]
  assert A % 8 == 0, "att_size must be a multiple of 8 for tile-aligned reshapes"

  if block_b is None:
    block_b = B                         # single-TC default (v5e/v6e)
  assert B % block_b == 0 and (block_b == B or block_b % 8 == 0)
  grid = (B // block_b,)

  mxu_dtype = fused["w_xh_a"].dtype
  # Host-side (free XLA) re-layouts: concat [x, prev_h] (avoids an in-kernel
  # lane concat) and pre-flatten + bf16-cast att (halves the dominant HBM stream).
  xh = jnp.concatenate([x, prev_h], axis=-1).astype(mxu_dtype)            # (B, I+R)
  att_flat = att.reshape(B * A, R).astype(mxu_dtype)                      # (B*A, R)

  def bspec(rows, cols):
    return pl.BlockSpec((rows, cols), lambda b: (b, 0))

  def wspec(shape):
    # Grid-invariant weights. At production sizes (big wproj) mark these
    # pipeline_mode=pl.Buffered(1) to avoid double-buffered weight VMEM; with
    # the default single-step grid here it makes no difference.
    return pl.BlockSpec(tuple(shape), lambda b: (0, 0))

  in_specs = [
      bspec(block_b, I + R),
      bspec(block_b * A, R),
      bspec(block_b, R),
  ] + [wspec(fused[k].shape) for k in FUSED_PARAM_ORDER]

  out_shape = (
      jax.ShapeDtypeStruct((B, 2 * R), jnp.float32),   # [next_c || next_h]
      jax.ShapeDtypeStruct((B, O), jnp.float32),
  )
  out_specs = (bspec(block_b, 2 * R), bspec(block_b, O))

  state, logsoft = pl.pallas_call(
      lstm_soft_att_kernel,
      out_shape=out_shape,
      grid=grid,
      in_specs=in_specs,
      out_specs=out_specs,
      compiler_params=pltpu.CompilerParams(
          dimension_semantics=("parallel",),
          vmem_limit_bytes=32 * 1024 * 1024,   # safe bound on all generations
      ),
  )(xh, att_flat, prev_c, *[fused[k] for k in FUSED_PARAM_ORDER])

  return state[:, :R], state[:, R:], logsoft


def make_params(key, input_size, output_size, rnn_size, att_size):
  """Deterministic init mimicking nn.Linear default: U(-1/sqrt(fan_in), ...)."""
  specs = {
      "wa2a": (rnn_size, att_size), "ba2a": (1, att_size),
      "wh2a": (rnn_size, att_size), "bh2a": (1, att_size),
      "wd2d": (att_size, 1),        "bd2d": (1, 1),
      "wi2h": (input_size, 4 * rnn_size), "bi2h": (1, 4 * rnn_size),
      "wh2h": (rnn_size, 4 * rnn_size),   "bh2h": (1, 4 * rnn_size),
      "wr2a": (rnn_size, 4 * rnn_size),   "br2a": (1, 4 * rnn_size),
      "wproj": (rnn_size, output_size),   "bproj": (1, output_size),
  }
  params = {}
  keys = jax.random.split(key, len(specs))
  for (name, shape), k in zip(specs.items(), keys):
    fan_in = shape[0] if name.startswith("w") else shape[1]
    bound = 1.0 / (fan_in ** 0.5)
    params[name] = jax.random.uniform(k, shape, jnp.float32, -bound, bound)
  return params


def reference(x, att, prev_c, prev_h, p, matmul_dtype=jnp.float32):
  """Pure-JAX reproduction of the PyTorch forward.

  `matmul_dtype` lets the reference mirror the kernel's MXU-operand policy
  (bf16 operands, f32 accumulation); pass jnp.float32 for exact PyTorch math.
  """
  def mm(a, w):
    return jnp.dot(a.astype(matmul_dtype), w.astype(matmul_dtype),
                   preferred_element_type=jnp.float32)

  B, A, R = att.shape
  att_v = (mm(att.reshape(-1, R), p["wa2a"]) + p["ba2a"]).reshape(B, A, A)
  att_h = mm(prev_h, p["wh2a"]) + p["bh2a"]
  dot = jnp.tanh(att_h[:, :, None] + att_v)
  scores = (dot.reshape(-1, A) @ p["wd2d"] + p["bd2d"]).reshape(B, A)
  w = jax.nn.softmax(scores, axis=-1)
  att_res = jnp.einsum("bar,ba->br", att, w)
  sums = (mm(x, p["wi2h"]) + p["bi2h"] + mm(prev_h, p["wh2h"]) + p["bh2h"]
          + mm(att_res, p["wr2a"]) + p["br2a"])
  i = jax.nn.sigmoid(sums[:, :R])
  f = jax.nn.sigmoid(sums[:, R:2 * R])
  o = jax.nn.sigmoid(sums[:, 2 * R:3 * R])
  g = jnp.tanh(sums[:, 3 * R:])
  nc = f * prev_c + i * g
  nh = o * jnp.tanh(nc)
  return nc, nh, jax.nn.log_softmax(mm(nh, p["wproj"]) + p["bproj"], axis=-1)


if __name__ == "__main__":
  B, input_size, output_size, rnn_size, att_size = 16, 32, 32, 32, 16

  key = jax.random.PRNGKey(0)
  kx, katt, kc, kh, kp = jax.random.split(key, 5)
  x = jax.random.normal(kx, (B, input_size), jnp.float32)
  att = jax.random.normal(katt, (B, att_size, rnn_size), jnp.float32)
  prev_c = jax.random.normal(kc, (B, rnn_size), jnp.float32)
  prev_h = jax.random.normal(kh, (B, rnn_size), jnp.float32)

  params = make_params(kp, input_size, output_size, rnn_size, att_size)
  fused = prepare_params(params, matmul_dtype=jnp.bfloat16)

  next_c, next_h, logsoft = jax.block_until_ready(
      lstm_soft_att(x, att, prev_c, prev_h, fused))

  # Reference mirrors the kernel's bf16-MXU-operand policy (the remaining gap
  # vs. exact f32 PyTorch math is bf16 operand rounding only).
  ref_c, ref_h, ref_ls = reference(x, att, prev_c, prev_h, params,
                                   matmul_dtype=jnp.bfloat16)
  assert jnp.allclose(next_c, ref_c, atol=2e-2, rtol=2e-2), \
      float(jnp.max(jnp.abs(next_c - ref_c)))
  assert jnp.allclose(next_h, ref_h, atol=2e-2, rtol=2e-2), \
      float(jnp.max(jnp.abs(next_h - ref_h)))
  assert jnp.allclose(logsoft, ref_ls, atol=2e-2, rtol=2e-2), \
      float(jnp.max(jnp.abs(logsoft - ref_ls)))

  print("KERNEL_OK")
</pallas_src>

<mosaic_0001>
module attributes {stable_mosaic.version = 11 : i64} {
  func.func @lstm_soft_att_kernel(%arg0: i32, %arg1: memref<16x64xbf16, #tpu.memory_space<vmem>>, %arg2: memref<256x32xbf16, #tpu.memory_space<vmem>>, %arg3: memref<16x32xf32, #tpu.memory_space<vmem>>, %arg4: memref<64x144xbf16, #tpu.memory_space<vmem>>, %arg5: memref<1x144xf32, #tpu.memory_space<vmem>>, %arg6: memref<32x16xbf16, #tpu.memory_space<vmem>>, %arg7: memref<1x16xf32, #tpu.memory_space<vmem>>, %arg8: memref<1x16xf32, #tpu.memory_space<vmem>>, %arg9: memref<32x128xbf16, #tpu.memory_space<vmem>>, %arg10: memref<32x32xbf16, #tpu.memory_space<vmem>>, %arg11: memref<1x32xf32, #tpu.memory_space<vmem>>, %arg12: memref<16x64xf32, #tpu.memory_space<vmem>>, %arg13: memref<16x32xf32, #tpu.memory_space<vmem>>) attributes {dimension_semantics = [#tpu.dimension_semantics<parallel>], iteration_bounds = array<i64: 1>, scalar_prefetch = 0 : i64, scratch_operands = 0 : i64, tpu.core_type = #tpu.core_type<tc>, window_params = [{transform_indices = @transform_0, window_bounds = array<i64: 16, 64>}, {transform_indices = @transform_1, window_bounds = array<i64: 256, 32>}, {transform_indices = @transform_2, window_bounds = array<i64: 16, 32>}, {pipeline_mode = #tpu.pipeline_mode<synchronous>, transform_indices = @transform_3, window_bounds = array<i64: 64, 144>}, {pipeline_mode = #tpu.pipeline_mode<synchronous>, transform_indices = @transform_4, window_bounds = array<i64: 1, 144>}, {pipeline_mode = #tpu.pipeline_mode<synchronous>, transform_indices = @transform_5, window_bounds = array<i64: 32, 16>}, {pipeline_mode = #tpu.pipeline_mode<synchronous>, transform_indices = @transform_6, window_bounds = array<i64: 1, 16>}, {pipeline_mode = #tpu.pipeline_mode<synchronous>, transform_indices = @transform_7, window_bounds = array<i64: 1, 16>}, {pipeline_mode = #tpu.pipeline_mode<synchronous>, transform_indices = @transform_8, window_bounds = array<i64: 32, 128>}, {pipeline_mode = #tpu.pipeline_mode<synchronous>, transform_indices = @transform_9, window_bounds = array<i64: 32, 32>}, {pipeline_mode = #tpu.pipeline_mode<synchronous>, transform_indices = @transform_10, window_bounds = array<i64: 1, 32>}, {transform_indices = @transform_11, window_bounds = array<i64: 16, 64>}, {transform_indices = @transform_12, window_bounds = array<i64: 16, 32>}]} {
    %c0 = arith.constant 0 : index
    %c0_0 = arith.constant 0 : index
    %0 = vector.load %arg3[%c0, %c0_0] : memref<16x32xf32, #tpu.memory_space<vmem>>, vector<16x32xf32>
    %c0_1 = arith.constant 0 : index
    %c0_2 = arith.constant 0 : index
    %1 = vector.load %arg1[%c0_1, %c0_2] : memref<16x64xbf16, #tpu.memory_space<vmem>>, vector<16x64xbf16>
    %c0_3 = arith.constant 0 : index
    %c0_4 = arith.constant 0 : index
    %2 = vector.load %arg4[%c0_3, %c0_4] : memref<64x144xbf16, #tpu.memory_space<vmem>>, vector<64x144xbf16>
    %cst = arith.constant dense<0.000000e+00> : vector<16x144xf32>
    %3 = tpu.matmul %1, %2, %cst {dimension_numbers = #tpu.dot_dimension_numbers<[1], [0], [0], [1], [0, 0, 1, 1], [], []>} : vector<16x64xbf16>, vector<64x144xbf16>, vector<16x144xf32> -> vector<16x144xf32>
    %c0_5 = arith.constant 0 : index
    %c0_6 = arith.constant 0 : index
    %4 = vector.load %arg5[%c0_5, %c0_6] : memref<1x144xf32, #tpu.memory_space<vmem>>, vector<1x144xf32>
    %5 = vector.broadcast %4 : vector<1x144xf32> to vector<16x144xf32>
    %6 = arith.addf %3, %5 : vector<16x144xf32>
    %7 = vector.extract_strided_slice %6 {offsets = [0, 0], sizes = [16, 128], strides = [1, 1]} : vector<16x144xf32> to vector<16x128xf32>
    %8 = vector.extract_strided_slice %6 {offsets = [0, 128], sizes = [16, 16], strides = [1, 1]} : vector<16x144xf32> to vector<16x16xf32>
    %c0_7 = arith.constant 0 : index
    %c0_8 = arith.constant 0 : index
    %9 = vector.load %arg2[%c0_7, %c0_8] : memref<256x32xbf16, #tpu.memory_space<vmem>>, vector<256x32xbf16>
    %c0_9 = arith.constant 0 : index
    %c0_10 = arith.constant 0 : index
    %10 = vector.load %arg6[%c0_9, %c0_10] : memref<32x16xbf16, #tpu.memory_space<vmem>>, vector<32x16xbf16>
    %cst_11 = arith.constant dense<0.000000e+00> : vector<256x16xf32>
    %11 = tpu.matmul %9, %10, %cst_11 {dimension_numbers = #tpu.dot_dimension_numbers<[1], [0], [0], [1], [0, 0, 1, 1], [], []>} : vector<256x32xbf16>, vector<32x16xbf16>, vector<256x16xf32> -> vector<256x16xf32>
    %c0_12 = arith.constant 0 : index
    %c0_13 = arith.constant 0 : index
    %12 = vector.load %arg7[%c0_12, %c0_13] : memref<1x16xf32, #tpu.memory_space<vmem>>, vector<1x16xf32>
    %13 = vector.broadcast %12 : vector<1x16xf32> to vector<256x16xf32>
    %14 = arith.addf %11, %13 : vector<256x16xf32>
    %15 = vector.shape_cast %14 : vector<256x16xf32> to vector<16x16x16xf32>
    %16 = vector.shape_cast %8 : vector<16x16xf32> to vector<16x16x1xf32>
    %17 = vector.broadcast %16 : vector<16x16x1xf32> to vector<16x16x16xf32>
    %18 = arith.addf %17, %15 : vector<16x16x16xf32>
    %19 = math.tanh %18 : vector<16x16x16xf32>
    %c0_14 = arith.constant 0 : index
    %c0_15 = arith.constant 0 : index
    %20 = vector.load %arg8[%c0_14, %c0_15] : memref<1x16xf32, #tpu.memory_space<vmem>>, vector<1x16xf32>
    %21 = vector.shape_cast %20 : vector<1x16xf32> to vector<1x1x16xf32>
    %22 = vector.broadcast %21 : vector<1x1x16xf32> to vector<16x16x16xf32>
    %23 = arith.mulf %19, %22 : vector<16x16x16xf32>
    %cst_16 = arith.constant dense<0.000000e+00> : vector<16x16xf32>
    %24 = vector.multi_reduction <add>, %23, %cst_16 [2] : vector<16x16x16xf32> to vector<16x16xf32>
    %cst_17 = arith.constant dense<0xFF800000> : vector<16xf32>
    %25 = vector.multi_reduction <maximumf>, %24, %cst_17 [1] : vector<16x16xf32> to vector<16xf32>
    %26 = vector.shape_cast %25 : vector<16xf32> to vector<16x1xf32>
    %27 = vector.broadcast %26 : vector<16x1xf32> to vector<16x16xf32>
    %28 = arith.subf %24, %27 : vector<16x16xf32>
    %29 = math.exp %28 : vector<16x16xf32>
    %cst_18 = arith.constant dense<0.000000e+00> : vector<16xf32>
    %30 = vector.multi_reduction <add>, %29, %cst_18 [1] : vector<16x16xf32> to vector<16xf32>
    %31 = vector.shape_cast %30 : vector<16xf32> to vector<16x1xf32>
    %32 = vector.broadcast %31 : vector<16x1xf32> to vector<16x16xf32>
    %33 = arith.divf %29, %32 : vector<16x16xf32>
    %34 = vector.shape_cast %9 : vector<256x32xbf16> to vector<16x16x32xbf16>
    %35 = vector.shape_cast %33 : vector<16x16xf32> to vector<16x16x1xf32>
    %36 = arith.extf %34 : vector<16x16x32xbf16> to vector<16x16x32xf32>
    %37 = vector.broadcast %35 : vector<16x16x1xf32> to vector<16x16x32xf32>
    %38 = arith.mulf %37, %36 : vector<16x16x32xf32>
    %cst_19 = arith.constant dense<0.000000e+00> : vector<16x32xf32>
    %39 = vector.multi_reduction <add>, %38, %cst_19 [1] : vector<16x16x32xf32> to vector<16x32xf32>
    %40 = arith.truncf %39 : vector<16x32xf32> to vector<16x32xbf16>
    %c0_20 = arith.constant 0 : index
    %c0_21 = arith.constant 0 : index
    %41 = vector.load %arg9[%c0_20, %c0_21] : memref<32x128xbf16, #tpu.memory_space<vmem>>, vector<32x128xbf16>
    %cst_22 = arith.constant dense<0.000000e+00> : vector<16x128xf32>
    %42 = tpu.matmul %40, %41, %cst_22 {dimension_numbers = #tpu.dot_dimension_numbers<[1], [0], [0], [1], [0, 0, 1, 1], [], []>} : vector<16x32xbf16>, vector<32x128xbf16>, vector<16x128xf32> -> vector<16x128xf32>
    %43 = arith.addf %7, %42 : vector<16x128xf32>
    %44 = vector.extract_strided_slice %43 {offsets = [0, 0], sizes = [16, 32], strides = [1, 1]} : vector<16x128xf32> to vector<16x32xf32>
    %45 = arith.negf %44 : vector<16x32xf32>
    %46 = math.exp %45 : vector<16x32xf32>
    %cst_23 = arith.constant 1.000000e+00 : f32
    %47 = vector.broadcast %cst_23 : f32 to vector<16x32xf32>
    %48 = arith.addf %47, %46 : vector<16x32xf32>
    %49 = arith.divf %47, %48 : vector<16x32xf32>
    %50 = vector.extract_strided_slice %43 {offsets = [0, 32], sizes = [16, 32], strides = [1, 1]} : vector<16x128xf32> to vector<16x32xf32>
    %51 = arith.negf %50 : vector<16x32xf32>
    %52 = math.exp %51 : vector<16x32xf32>
    %cst_24 = arith.constant 1.000000e+00 : f32
    %53 = vector.broadcast %cst_24 : f32 to vector<16x32xf32>
    %54 = arith.addf %53, %52 : vector<16x32xf32>
    %55 = arith.divf %53, %54 : vector<16x32xf32>
    %56 = vector.extract_strided_slice %43 {offsets = [0, 64], sizes = [16, 32], strides = [1, 1]} : vector<16x128xf32> to vector<16x32xf32>
    %57 = arith.negf %56 : vector<16x32xf32>
    %58 = math.exp %57 : vector<16x32xf32>
    %cst_25 = arith.constant 1.000000e+00 : f32
    %59 = vector.broadcast %cst_25 : f32 to vector<16x32xf32>
    %60 = arith.addf %59, %58 : vector<16x32xf32>
    %61 = arith.divf %59, %60 : vector<16x32xf32>
    %62 = vector.extract_strided_slice %43 {offsets = [0, 96], sizes = [16, 32], strides = [1, 1]} : vector<16x128xf32> to vector<16x32xf32>
    %63 = math.tanh %62 : vector<16x32xf32>
    %64 = arith.mulf %55, %0 : vector<16x32xf32>
    %65 = arith.mulf %49, %63 : vector<16x32xf32>
    %66 = arith.addf %64, %65 : vector<16x32xf32>
    %67 = math.tanh %66 : vector<16x32xf32>
    %68 = arith.mulf %61, %67 : vector<16x32xf32>
    %69 = arith.truncf %68 : vector<16x32xf32> to vector<16x32xbf16>
    %c0_26 = arith.constant 0 : index
    %c0_27 = arith.constant 0 : index
    %70 = vector.load %arg10[%c0_26, %c0_27] : memref<32x32xbf16, #tpu.memory_space<vmem>>, vector<32x32xbf16>
    %cst_28 = arith.constant dense<0.000000e+00> : vector<16x32xf32>
    %71 = tpu.matmul %69, %70, %cst_28 {dimension_numbers = #tpu.dot_dimension_numbers<[1], [0], [0], [1], [0, 0, 1, 1], [], []>} : vector<16x32xbf16>, vector<32x32xbf16>, vector<16x32xf32> -> vector<16x32xf32>
    %c0_29 = arith.constant 0 : index
    %c0_30 = arith.constant 0 : index
    %72 = vector.load %arg11[%c0_29, %c0_30] : memref<1x32xf32, #tpu.memory_space<vmem>>, vector<1x32xf32>
    %73 = vector.broadcast %72 : vector<1x32xf32> to vector<16x32xf32>
    %74 = arith.addf %71, %73 : vector<16x32xf32>
    %cst_31 = arith.constant dense<0xFF800000> : vector<16xf32>
    %75 = vector.multi_reduction <maximumf>, %74, %cst_31 [1] : vector<16x32xf32> to vector<16xf32>
    %76 = vector.shape_cast %75 : vector<16xf32> to vector<16x1xf32>
    %77 = vector.broadcast %76 : vector<16x1xf32> to vector<16x32xf32>
    %78 = arith.subf %74, %77 : vector<16x32xf32>
    %79 = math.exp %78 : vector<16x32xf32>
    %cst_32 = arith.constant dense<0.000000e+00> : vector<16xf32>
    %80 = vector.multi_reduction <add>, %79, %cst_32 [1] : vector<16x32xf32> to vector<16xf32>
    %81 = vector.shape_cast %80 : vector<16xf32> to vector<16x1xf32>
    %82 = math.log %81 : vector<16x1xf32>
    %83 = arith.addf %82, %76 : vector<16x1xf32>
    %84 = vector.broadcast %83 : vector<16x1xf32> to vector<16x32xf32>
    %85 = arith.subf %74, %84 : vector<16x32xf32>
    %c0_33 = arith.constant 0 : index
    %c0_34 = arith.constant 0 : index
    %86 = vector.load %arg12[%c0_33, %c0_34] : memref<16x64xf32, #tpu.memory_space<vmem>>, vector<16x32xf32>
    tpu.vector_store %arg12[%c0_33, %c0_34], %66 {strides = array<i32>} : memref<16x64xf32, #tpu.memory_space<vmem>>, vector<16x32xf32>,
    %c0_35 = arith.constant 0 : index
    %c32 = arith.constant 32 : index
    %87 = vector.load %arg12[%c0_35, %c32] : memref<16x64xf32, #tpu.memory_space<vmem>>, vector<16x32xf32>
    tpu.vector_store %arg12[%c0_35, %c32], %68 {strides = array<i32>} : memref<16x64xf32, #tpu.memory_space<vmem>>, vector<16x32xf32>,
    %c0_36 = arith.constant 0 : index
    %c0_37 = arith.constant 0 : index
    %88 = vector.load %arg13[%c0_36, %c0_37] : memref<16x32xf32, #tpu.memory_space<vmem>>, vector<16x32xf32>
    tpu.vector_store %arg13[%c0_36, %c0_37], %85 {strides = array<i32>} : memref<16x32xf32, #tpu.memory_space<vmem>>, vector<16x32xf32>,
    return
  }
  func.func @transform_0(%arg0: i32) -> (i32, i32) {
    %c0_i32 = arith.constant 0 : i32
    %c0_i32_0 = arith.constant 0 : i32
    return %arg0, %c0_i32 : i32, i32
  }
  func.func @transform_1(%arg0: i32) -> (i32, i32) {
    %c0_i32 = arith.constant 0 : i32
    %c0_i32_0 = arith.constant 0 : i32
    return %arg0, %c0_i32 : i32, i32
  }
  func.func @transform_2(%arg0: i32) -> (i32, i32) {
    %c0_i32 = arith.constant 0 : i32
    %c0_i32_0 = arith.constant 0 : i32
    return %arg0, %c0_i32 : i32, i32
  }
  func.func @transform_3(%arg0: i32) -> (i32, i32) {
    %c0_i32 = arith.constant 0 : i32
    %c0_i32_0 = arith.constant 0 : i32
    %c0_i32_1 = arith.constant 0 : i32
    return %c0_i32, %c0_i32_0 : i32, i32
  }
  func.func @transform_4(%arg0: i32) -> (i32, i32) {
    %c0_i32 = arith.constant 0 : i32
    %c0_i32_0 = arith.constant 0 : i32
    %c0_i32_1 = arith.constant 0 : i32
    return %c0_i32, %c0_i32_0 : i32, i32
  }
  func.func @transform_5(%arg0: i32) -> (i32, i32) {
    %c0_i32 = arith.constant 0 : i32
    %c0_i32_0 = arith.constant 0 : i32
    %c0_i32_1 = arith.constant 0 : i32
    return %c0_i32, %c0_i32_0 : i32, i32
  }
  func.func @transform_6(%arg0: i32) -> (i32, i32) {
    %c0_i32 = arith.constant 0 : i32
    %c0_i32_0 = arith.constant 0 : i32
    %c0_i32_1 = arith.constant 0 : i32
    return %c0_i32, %c0_i32_0 : i32, i32
  }
  func.func @transform_7(%arg0: i32) -> (i32, i32) {
    %c0_i32 = arith.constant 0 : i32
    %c0_i32_0 = arith.constant 0 : i32
    %c0_i32_1 = arith.constant 0 : i32
    return %c0_i32, %c0_i32_0 : i32, i32
  }
  func.func @transform_8(%arg0: i32) -> (i32, i32) {
    %c0_i32 = arith.constant 0 : i32
    %c0_i32_0 = arith.constant 0 : i32
    %c0_i32_1 = arith.constant 0 : i32
    return %c0_i32, %c0_i32_0 : i32, i32
  }
  func.func @transform_9(%arg0: i32) -> (i32, i32) {
    %c0_i32 = arith.constant 0 : i32
    %c0_i32_0 = arith.constant 0 : i32
    %c0_i32_1 = arith.constant 0 : i32
    return %c0_i32, %c0_i32_0 : i32, i32
  }
  func.func @transform_10(%arg0: i32) -> (i32, i32) {
    %c0_i32 = arith.constant 0 : i32
    %c0_i32_0 = arith.constant 0 : i32
    %c0_i32_1 = arith.constant 0 : i32
    return %c0_i32, %c0_i32_0 : i32, i32
  }
  func.func @transform_11(%arg0: i32) -> (i32, i32) {
    %c0_i32 = arith.constant 0 : i32
    %c0_i32_0 = arith.constant 0 : i32
    return %arg0, %c0_i32 : i32, i32
  }
  func.func @transform_12(%arg0: i32) -> (i32, i32) {
    %c0_i32 = arith.constant 0 : i32
    %c0_i32_0 = arith.constant 0 : i32
    return %arg0, %c0_i32 : i32, i32
  }
}

</mosaic_0001>

<bundles_post_ra>
// kernel: tpu_custom_call.1
= control target key start
LH: loop header
LB: loop body
LE: loop exit
PB: predicated region body
PF: predicated region fallthrough
CT: control target
= control target key end

     0   :  { %18 = vsyncpa [#allocation3], 0  ;;  %v2839_v2 = vmov 0   ;;  %vm294_vm0 = vcmask 261120   ;;  %vm112_vm1 = vcmask 523264   ;;  %s3956_s0 = inlined_call_operand.vmem [shape: bf16[16,64], index: 0, kind: input, shape index: {}]   ;;  %s3957_s1 = inlined_call_operand.vmem [shape: bf16[256,32], index: 1, kind: input, shape index: {}]   ;;  %s3958_s2 = inlined_call_operand.vmem [shape: f32[16,32], index: 2, kind: input, shape index: {}]   ;;  %s3959_s3 = inlined_call_operand.vmem [shape: bf16[64,144], index: 3, kind: input, shape index: {}]   ;;  %s3960_s4 = inlined_call_operand.vmem [shape: f32[1,144], index: 4, kind: input, shape index: {}]   ;;  %s3961_s5 = inlined_call_operand.vmem [shape: bf16[32,16], index: 5, kind: input, shape index: {}]   ;;  %s3962_s6 = inlined_call_operand.vmem [shape: f32[1,16], index: 6, kind: input, shape index: {}]   ;;  %s3963_s7 = inlined_call_operand.vmem [shape: f32[1,16], index: 7, kind: input, shape index: {}]   ;;  %s3964_s8 = inlined_call_operand.vmem [shape: bf16[32,128], index: 8, kind: input, shape index: {}]   ;;  %s3965_s9 = inlined_call_operand.vmem [shape: bf16[32,32], index: 9, kind: input, shape index: {}]   ;;  %s3966_s10 = inlined_call_operand.vmem [shape: f32[1,32], index: 10, kind: input, shape index: {}]   ;;  %s3967_s11 = inlined_call_operand.hbm [shape: f32[16,64], index: 11, kind: output, shape index: {0}]   ;;  %s3968_s12 = inlined_call_operand.hbm [shape: f32[16,32], index: 12, kind: output, shape index: {1}]  }
   0x1   :  { %v2539_v0 = vld [vmem:[%s3959_s3 + $0x4] ss:$8 sps:$4 sm:$0xff]   ;;  %v2541_v1 = vld [vmem:[%s3959_s3] ss:$8 sps:$4 sm:$0xff]   ;;  %148 = vmatprep.mubr.bf16.mxu0 %v2839_v2  ;;  %2538 = vset.pattern.permute.xlu0 %v2839_v2  ;;  %v2542_v3 = vld [vmem:[%s3959_s3 + $0x14] ss:$8 sps:$4 sm:$0xff]  }
   0x2   :  { %116 = vmatprep.subr.bf16.mxu0 %v2539_v0  ;;  %2537 = vset.pattern.permute.xlu1 %v2839_v2  ;;  %v2544_v4 = vld [vmem:[%s3959_s3 + $0x10] ss:$8 sps:$4 sm:$0xff]   ;;  %v2545_v5 = vld [vmem:[%s3959_s3 + $0x24] ss:$8 sps:$4 sm:$0xff]   ;;  %v2547_v6 = vld [vmem:[%s3959_s3 + $0x20] ss:$8 sps:$4 sm:$0xff]  }
   0x3   :  { %117 = vmatpush1.bf16.msra.mxu0 %v2541_v1  ;;  %v2552_v7 = vld [vmem:[%s3961_s5] sm:$0xff]   ;;  %v2548_v8 = vld [vmem:[%s3959_s3 + $0x34] ss:$8 sps:$4 sm:$0xff]   ;;  %v2553_v9 = vld [vmem:[%s3961_s5 + $0x8] sm:$0xff]  }
   0x4   :  { %118 = vmatprep.subr.bf16.mxu0 %v2542_v3  ;;  %2523 = vmatprep.subr.bf16.mxu1 %v2552_v7  ;;  %v167_v10 = vld [vmem:[%s3957_s1 + $0x20] sm:$0xff]   ;;  %v169_v11 = vld [vmem:[%s3957_s1 + $0x28] sm:$0xff]   ;;  %v2550_v12 = vld [vmem:[%s3959_s3 + $0x30] ss:$8 sps:$4 sm:$0xff]  }
   0x5   :  { %2525 = vmatpush3.bf16.msra.mxu1 %v2552_v7  ;;  %v171_v13 = vld [vmem:[%s3957_s1 + $0x30] sm:$0xff]   ;;  %v159_v14 = vld [vmem:[%s3957_s1] sm:$0xff]   ;;  %2483 = vmatprep.mubr.msk.bf16.mxu1 %vm294_vm0, %v167_v10 }
   0x6   :  { %2524 = vmatprep.subr.bf16.mxu1 %v2553_v9  ;;  %v2551_v15 = vld [vmem:[%s3956_s0] sm:$0xff]  }
   0x7   :  { %119 = vmatpush1.bf16.msra.mxu0 %v2544_v4 }
   0x8   :  { %120 = vmatprep.subr.bf16.mxu0 %v2545_v5 }
   0x9   :  { %2526 = vmatpush3.bf16.msra.mxu1 %v2553_v9 }
   0xb   :  { %121 = vmatpush1.bf16.msra.mxu0 %v2547_v6 }
   0xc   :  { %122 = vmatprep.subr.bf16.mxu0 %v2548_v8 }
   0xf   :  { %123 = vmatpush1.bf16.msra.mxu0 %v2550_v12 }
  0x10   :  { %2471 = vmatprep.subr.bf16.mxu0 %v2552_v7 }
  0x11   :  { %19 = vsyncpa [#allocation5], 0  ;;  %2484 = vmatmul.mubr.msk.bf16.vlgmr.msra.gmra.mrb[0].mxu1 %vm294_vm0, %v169_v11  ;;  %v173_v16 = vld [vmem:[%s3957_s1 + $0x38] sm:$0xff]   ;;  %v161_v17 = vld [vmem:[%s3957_s1 + $0x8] sm:$0xff]   ;;  %v57_v28 = vlaneseq  ;;  %vm783_vm2 = vcmask 130048   ;;  %vm923_vm3 = vcmask 130112  }
  0x12   :  { %2401 = vmatmul.mubr.msk.bf16.vlgmr.msra.gmra.mrb[0].mxu0 %vm112_vm1, %v2551_v15  ;;  %2487 = vmatprep.mubr.msk.bf16.mxu1 %vm294_vm0, %v171_v13  ;;  %v175_v18 = vld [vmem:[%s3957_s1 + $0x40] sm:$0xff]   ;;  %v163_v19 = vld [vmem:[%s3957_s1 + $0x10] sm:$0xff]   ;;  %v177_v20 = vld [vmem:[%s3957_s1 + $0x48] sm:$0xff]   ;;  %vm1060_vm4 = vcmask 1041409   ;;  %vm1062_vm5 = vcmask 1042434   ;;  %vm1064_vm6 = vcmask 1043459  }
  0x13   :  { %2472 = vmatpush3.bf16.msra.mxu0 %v2552_v7  ;;  %2475 = vmatprep.mubr.msk.bf16.mxu0 %vm294_vm0, %v159_v14  ;;  %v165_v21 = vld [vmem:[%s3957_s1 + $0x18] sm:$0xff]   ;;  %v179_v22 = vld [vmem:[%s3957_s1 + $0x50] sm:$0xff]   ;;  %v183_v24 = vld [vmem:[%s3957_s1 + $0x60] sm:$0xff]   ;;  %v3012_v29 = vshrl.u32 %v57_v28, 7  ;;  %vm1066_vm7 = vcmask 1044484   ;;  %vm1068_vm8 = vcmask 1045509  }
  0x14   :  { %2473 = vmatprep.subr.bf16.mxu0 %v2553_v9  ;;  %v181_v23 = vld [vmem:[%s3957_s1 + $0x58] sm:$0xff]   ;;  %v185_v25 = vld [vmem:[%s3957_s1 + $0x68] sm:$0xff]   ;;  %v187_v26 = vld [vmem:[%s3957_s1 + $0x70] sm:$0xff]   ;;  %vm1070_vm9 = vcmask 1046534   ;;  %vm1072_vm10 = vcmask 1047559   ;;  %vm2841_vm11 = vmmov 0  }
  0x15   :  { %v189_v27 = vld [vmem:[%s3957_s1 + $0x78] sm:$0xff]   ;;  %v3015_v30 = vsub.s32 1, %v3012_v29  ;;  %v55_v31 = vld [vmem:[%s3960_s4] sm:$0x3]  ;;  %v3024_v35 = vsub.s32 0, %v3012_v29  ;;  %v3037_v44 = vsub.s32 2, %v3012_v29 }
  0x16   :  { %v3051_v51 = vsub.s32 3, %v3012_v29  ;;  %v3061_v56 = vsub.s32 4, %v3012_v29  ;;  %v3075_v63 = vsub.s32 5, %v3012_v29  ;;  %v3085_v4 = vsub.s32 6, %v3012_v29  ;;  %s2842_s30 = smov 32   ;;  %s2843_s17 = smov 64  }
  0x17   :  { %2474 = vmatpush3.bf16.msra.mxu0 %v2553_v9  ;;  %v64_v32 = vrot.slane %v55_v31, %v3015_v30  ;;  %v3091_v7 = vsub.s32 7, %v3012_v29  ;;  %vm2355_vm12 = vcmask 523520  }
  0x19   :  { %2488 = vmatmul.mubr.msk.bf16.gmra.mrb[4].mxu1 %vm294_vm0, %v173_v16 }
  0x1a   :  { %2476 = vmatmul.mubr.msk.bf16.vlgmr.msra.gmra.mrb[4].mxu0 %vm294_vm0, %v161_v17  ;;  %2491 = vmatprep.mubr.msk.bf16.mxu1 %vm294_vm0, %v175_v18 }
  0x1b   :  { %2479 = vmatprep.mubr.msk.bf16.mxu0 %vm294_vm0, %v163_v19 }
  0x21   :  { %2492 = vmatmul.mubr.msk.bf16.gmra.mrb[8].mxu1 %vm294_vm0, %v177_v20 }
  0x22   :  { %2480 = vmatmul.mubr.msk.bf16.gmra.mrb[8].mxu0 %vm294_vm0, %v165_v21  ;;  %2495 = vmatprep.mubr.msk.bf16.mxu1 %vm294_vm0, %v179_v22 }
  0x29   :  { %2496 = vmatmul.mubr.msk.bf16.gmra.mrb[12].mxu1 %vm294_vm0, %v181_v23  ;;  %v3120_v23 = vld [vmem:[%s3962_s6] ss:$0 sm:$0xff]  ;;  %s2844_s6 = smov 96  }
  0x2a   :  { %2499 = vmatprep.mubr.msk.bf16.mxu1 %vm294_vm0, %v183_v24 }
  0x31   :  { %2500 = vmatmul.mubr.msk.bf16.gmra.mrb[16].mxu1 %vm294_vm0, %v185_v25 }
  0x32   :  { %2503 = vmatprep.mubr.msk.bf16.mxu1 %vm294_vm0, %v187_v26 }
  0x39   :  { %2504 = vmatmul.mubr.msk.bf16.gmra.mrb[20].mxu1 %vm294_vm0, %v189_v27 }
  0xe4   :  { %v3030_v41 = vpop.f32.mrb[0].mxu1 }
  0xe5   :  { %v3021_v33 = vpop.f32.mrb[0].mxu0  ;;  %v3032_v42 = vpop.f32.mrb[1].mxu1 }
  0xe6   :  { %3971 = vst [vmem:[#allocation8_spill] sm:$0xff] %v3021_v33  ;;  %v152_v34 = vpop.f32.mrb[1].mxu0  ;;  %v3034_v43 = vpop.f32.mrb[2].mxu1 }
  0xe7   :  { %v153_v36 = vadd.f32 %v152_v34, %v64_v32  ;;  %v3026_v37 = vpop.f32.mrb[2].mxu0  ;;  %v3041_v46 = vpop.f32.mrb[3].mxu1 }
  0xe8   :  { %3972 = vst [vmem:[#allocation9_spill] sm:$0xff] %v3026_v37  ;;  %v156_v38 = vpop.f32.mrb[3].mxu0 }
  0xe9   :  { %v518_v39 = vrot.slane %v153_v36, %v3015_v30  ;;  %v507_v40 = vrot.slane %v153_v36, %v3024_v35  ;;  %v529_v50 = vrot.slane %v153_v36, %v3037_v44  ;;  %v540_v55 = vrot.slane %v153_v36, %v3051_v51 }
  0xea   :  { %v551_v62 = vrot.slane %v153_v36, %v3061_v56  ;;  %v562_v3 = vrot.slane %v153_v36, %v3075_v63  ;;  %v573_v6 = vrot.slane %v153_v36, %v3085_v4  ;;  %v157_v11 = vadd.f32 %v156_v38, %v64_v32 }
  0xeb   :  { %520 = vbcast.lane.b32.xlu1 %v518_v39, 256  ;;  %509 = vbcast.lane.b32.xlu0 %v507_v40, 256  ;;  %v584_v12 = vrot.slane %v153_v36, %v3091_v7 }
  0xec   :  { %v3053_v52 = vpop.f32.mrb[4].mxu1  ;;  %v595_v14 = vrot.slane %v157_v11, %v3024_v35  ;;  %v606_v18 = vrot.slane %v157_v11, %v3015_v30  ;;  %v617_v20 = vrot.slane %v157_v11, %v3037_v44  ;;  %v628_v25 = vrot.slane %v157_v11, %v3051_v51 }
  0xed   :  { %v3039_v45 = vpop.f32.mrb[4].mxu0  ;;  %v3055_v53 = vpop.f32.mrb[5].mxu1  ;;  %v639_v31 = vrot.slane %v157_v11, %v3061_v56  ;;  %v650_v32 = vrot.slane %v157_v11, %v3075_v63  ;;  %v661_v34 = vrot.slane %v157_v11, %v3085_v4  ;;  %v672_v36 = vrot.slane %v157_v11, %v3091_v7 }
  0xee   :  { %v3043_v47 = vpop.f32.mrb[5].mxu0  ;;  %v3057_v54 = vpop.f32.mrb[6].mxu1  ;;  %v386_v38 = vadd.f32 %v3039_v45, %v3120_v23 }
  0xef   :  { %524 = vbcast.lane.b32.xlu1 %v518_v39, 264  ;;  %513 = vbcast.lane.b32.xlu0 %v507_v40, 264  ;;  %v3045_v48 = vpop.f32.mrb[6].mxu0  ;;  %v3065_v58 = vpop.f32.mrb[7].mxu1  ;;  %v378_v39 = vadd.f32 %v3120_v23, %v3043_v47 }
  0xf0   :  { %v3047_v49 = vpop.f32.mrb[7].mxu0 }
  0xf3   :  { %535 = vbcast.lane.b32.xlu1 %v529_v50, 264  ;;  %531 = vbcast.lane.b32.xlu0 %v529_v50, 256 }
  0xf4   :  { %v3077_v0 = vpop.f32.mrb[8].mxu1 }
  0xf5   :  { %v3063_v57 = vpop.f32.mrb[8].mxu0  ;;  %v3079_v1 = vpop.f32.mrb[9].mxu1 }
  0xf6   :  { %v3067_v59 = vpop.f32.mrb[9].mxu0  ;;  %v3081_v2 = vpop.f32.mrb[10].mxu1 }
  0xf7   :  { %546 = vbcast.lane.b32.xlu1 %v540_v55, 264  ;;  %542 = vbcast.lane.b32.xlu0 %v540_v55, 256  ;;  %v3069_v60 = vpop.f32.mrb[10].mxu0  ;;  %v3087_v5 = vpop.f32.mrb[11].mxu1  ;;  %v394_v45 = vadd.f32 %v3120_v23, %v3067_v59 }
  0xf8   :  { %v3071_v61 = vpop.f32.mrb[11].mxu0 }
  0xf9   :  { %v397_v47 = vadd.f32 %v3120_v23, %v3071_v61  ;;  %v3151_v61 = vld [vmem:[%s3963_s7] ss:$0 sm:$0xff] }
  0xfb   :  { %557 = vbcast.lane.b32.xlu1 %v551_v62, 264  ;;  %553 = vbcast.lane.b32.xlu0 %v551_v62, 256 }
  0xfc   :  { %v3093_v8 = vpop.f32.mrb[12].mxu1 }
  0xfd   :  { %v3095_v9 = vpop.f32.mrb[13].mxu1 }
  0xfe   :  { %v3097_v10 = vpop.f32.mrb[14].mxu1 }
  0xff   :  { %568 = vbcast.lane.b32.xlu1 %v562_v3, 264  ;;  %564 = vbcast.lane.b32.xlu0 %v562_v3, 256  ;;  %v3100_v13 = vpop.f32.mrb[15].mxu1  ;;  %v389_v3 = vadd.f32 %v3045_v48, %v3120_v23 }
 0x103   :  { %579 = vbcast.lane.b32.xlu1 %v573_v6, 264  ;;  %575 = vbcast.lane.b32.xlu0 %v573_v6, 256  ;;  %v381_v6 = vadd.f32 %v3120_v23, %v3047_v49  ;;  %v402_v49 = vadd.f32 %v3063_v57, %v3120_v23  ;;  %v413_v57 = vadd.f32 %v3120_v23, %v3041_v46 }
 0x104   :  { %v3103_v15 = vpop.f32.mrb[16].mxu1  ;;  %v418_v46 = vadd.f32 %v3030_v41, %v3120_v23 }
 0x105   :  { %v3105_v16 = vpop.f32.mrb[17].mxu1 }
 0x106   :  { %v3107_v17 = vpop.f32.mrb[18].mxu1 }
 0x107   :  { %590 = vbcast.lane.b32.xlu1 %v584_v12, 264  ;;  %586 = vbcast.lane.b32.xlu0 %v584_v12, 256  ;;  %v3110_v19 = vpop.f32.mrb[19].mxu1 }
 0x10b   :  { %601 = vbcast.lane.b32.xlu1 %v595_v14, 264  ;;  %597 = vbcast.lane.b32.xlu0 %v595_v14, 256 }
 0x10c   :  { %v3113_v21 = vpop.f32.mrb[20].mxu1 }
 0x10d   :  { %v3115_v22 = vpop.f32.mrb[21].mxu1 }
 0x10e   :  { %v2506_v24 = vpop.f32.mrb[22].mxu1 }
 0x10f   :  { %612 = vbcast.lane.b32.xlu1 %v606_v18, 264  ;;  %608 = vbcast.lane.b32.xlu0 %v606_v18, 256  ;;  %v3124_v26 = vadd.f32 %v2506_v24, %v3120_v23  ;;  %v3126_v27 = vpop.f32.mrb[23].mxu1 }
 0x113   :  { %623 = vbcast.lane.b32.xlu1 %v617_v20, 264  ;;  %619 = vbcast.lane.b32.xlu0 %v617_v20, 256 }
 0x117   :  { %634 = vbcast.lane.b32.xlu1 %v628_v25, 264  ;;  %630 = vbcast.lane.b32.xlu0 %v628_v25, 256 }
 0x11b   :  { %645 = vbcast.lane.b32.xlu1 %v639_v31, 264  ;;  %641 = vbcast.lane.b32.xlu0 %v639_v31, 256  ;;  %v405_v31 = vadd.f32 %v3069_v60, %v3120_v23 }
 0x11f   :  { %656 = vbcast.lane.b32.xlu1 %v650_v32, 264  ;;  %652 = vbcast.lane.b32.xlu0 %v650_v32, 256 }
 0x123   :  { %667 = vbcast.lane.b32.xlu1 %v661_v34, 264  ;;  %663 = vbcast.lane.b32.xlu0 %v661_v34, 256 }
 0x127   :  { %678 = vbcast.lane.b32.xlu1 %v672_v36, 264  ;;  %674 = vbcast.lane.b32.xlu0 %v672_v36, 256  ;;  %v410_v36 = vadd.f32 %v3120_v23, %v3032_v42 }
 0x15d   :  { %v521_v40 = vpop.permute.xlu1 %520  ;;  %v510_v50 = vpop.permute.xlu0 %509 }
 0x15e   :  { %v682_v55 = vadd.f32 %v521_v40, %v386_v38  ;;  %v680_v62 = vadd.f32 %v510_v50, %v378_v39 }
 0x160   :  { %2590 = vtanh.f32 %v682_v55 }
 0x161   :  { %2592 = vtanh.f32 %v680_v62  ;;  %v525_v11 = vpop.permute.xlu1 %524  ;;  %v514_v12 = vpop.permute.xlu0 %513 }
 0x162   :  { %v683_v14 = vadd.f32 %v525_v11, %v389_v3  ;;  %v681_v18 = vadd.f32 %v514_v12, %v381_v6 }
 0x164   :  { %2594 = vtanh.f32 %v683_v14 }
 0x165   :  { %2596 = vtanh.f32 %v681_v18  ;;  %v536_v20 = vpop.permute.xlu1 %535  ;;  %v532_v24 = vpop.permute.xlu0 %531  ;;  %v426_v18 = vadd.f32 %v3120_v23, %v3055_v53 }
 0x166   :  { %v685_v48 = vadd.f32 %v536_v20, %v397_v47  ;;  %v684_v25 = vadd.f32 %v532_v24, %v394_v45  ;;  %v421_v45 = vadd.f32 %v3034_v43, %v3120_v23 }
 0x168   :  { %2598 = vtanh.f32 %v685_v48  ;;  %v429_v48 = vadd.f32 %v3120_v23, %v3065_v58 }
 0x169   :  { %2600 = vtanh.f32 %v684_v25  ;;  %v547_v59 = vpop.permute.xlu1 %546  ;;  %v543_v32 = vpop.permute.xlu0 %542 }
 0x16a   :  { %v2591_v34 = vpop.eup %2590  ;;  %v687_v38 = vadd.f32 %v547_v59, %v405_v31  ;;  %v686_v39 = vadd.f32 %v543_v32, %v402_v49 }
 0x16b   :  { %v2593_v40 = vpop.eup %2592  ;;  %v753_v62 = vmul.f32 %v2591_v34, %v3151_v61 }
 0x16c   :  { %2602 = vtanh.f32 %v687_v38  ;;  %v751_v60 = vmul.f32 %v2593_v40, %v3151_v61 }
 0x16d   :  { %2604 = vtanh.f32 %v686_v39  ;;  %v558_v50 = vpop.permute.xlu1 %557  ;;  %v554_v55 = vpop.permute.xlu0 %553  ;;  %v790_v24 = vsel %vm783_vm2, %v753_v62, 0.0 }
 0x16e   :  { %v2595_v3 = vpop.eup %2594  ;;  %v689_v6 = vadd.f32 %v558_v50, %v413_v57  ;;  %v688_v11 = vadd.f32 %v554_v55, %v410_v36  ;;  %v784_v42 = vsel %vm783_vm2, %v751_v60, 0.0  ;;  %v434_v50 = vadd.f32 %v3053_v52, %v3120_v23 }
 0x16f   :  { %v2597_v12 = vpop.eup %2596  ;;  %785 = vadd.xlane.f32.xlu0 %v784_v42  ;;  %v754_v43 = vmul.f32 %v2595_v3, %v3151_v61  ;;  %v437_v55 = vadd.f32 %v3057_v54, %v3120_v23  ;;  %v442_v3 = vadd.f32 %v3120_v23, %v3079_v1 }
 0x170   :  { %2606 = vtanh.f32 %v689_v6  ;;  %v752_v14 = vmul.f32 %v2597_v12, %v3151_v61  ;;  %v445_v12 = vadd.f32 %v3120_v23, %v3087_v5  ;;  %v453_v5 = vadd.f32 %v3081_v2, %v3120_v23 }
 0x171   :  { %2608 = vtanh.f32 %v688_v11  ;;  %v569_v47 = vpop.permute.xlu1 %568  ;;  %v565_v20 = vpop.permute.xlu0 %564  ;;  %v793_v57 = vsel %vm783_vm2, %v754_v43, 0.0  ;;  %v458_v2 = vadd.f32 %v3120_v23, %v3095_v9 }
 0x172   :  { %v2599_v25 = vpop.eup %2598  ;;  %v691_v49 = vadd.f32 %v569_v47, %v421_v45  ;;  %v690_v41 = vadd.f32 %v565_v20, %v418_v46  ;;  %v787_v31 = vsel %vm783_vm2, %v752_v14, 0.0  ;;  %v450_v47 = vadd.f32 %v3077_v0, %v3120_v23 }
 0x173   :  { %v2601_v59 = vpop.eup %2600  ;;  %791 = vadd.xlane.f32.xlu0 %v790_v24  ;;  %788 = vadd.xlane.f32.xlu1 %v787_v31  ;;  %v756_v36 = vmul.f32 %v2599_v25, %v3151_v61 }
 0x174   :  { %2610 = vtanh.f32 %v691_v49  ;;  %v755_v53 = vmul.f32 %v2601_v59, %v3151_v61 }
 0x175   :  { %2612 = vtanh.f32 %v690_v41  ;;  %v580_v32 = vpop.permute.xlu1 %579  ;;  %v576_v34 = vpop.permute.xlu0 %575  ;;  %v799_v42 = vsel %vm783_vm2, %v756_v36, 0.0  ;;  %v461_v36 = vadd.f32 %v3120_v23, %v3100_v13  ;;  %v469_v13 = vadd.f32 %v3097_v10, %v3120_v23 }
 0x176   :  { %v2603_v38 = vpop.eup %2602  ;;  %v693_v58 = vadd.f32 %v580_v32, %v429_v48  ;;  %v692_v39 = vadd.f32 %v576_v34, %v426_v18  ;;  %v796_v40 = vsel %vm783_vm2, %v755_v53, 0.0  ;;  %v474_v10 = vadd.f32 %v3120_v23, %v3105_v16 }
 0x177   :  { %v2605_v60 = vpop.eup %2604  ;;  %794 = vadd.xlane.f32.xlu0 %v793_v57  ;;  %797 = vadd.xlane.f32.xlu1 %v796_v40  ;;  %v758_v54 = vmul.f32 %v2603_v38, %v3151_v61 }
 0x178   :  { %2614 = vtanh.f32 %v693_v58  ;;  %v757_v62 = vmul.f32 %v2605_v60, %v3151_v61 }
 0x179   :  { %2616 = vtanh.f32 %v692_v39  ;;  %v591_v6 = vpop.permute.xlu1 %590  ;;  %v587_v11 = vpop.permute.xlu0 %586  ;;  %v805_v31 = vsel %vm783_vm2, %v758_v54, 0.0 }
 0x17a   :  { %v2607_v46 = vpop.eup %2606  ;;  %v695_v45 = vadd.f32 %v591_v6, %v437_v55  ;;  %v694_v52 = vadd.f32 %v587_v11, %v434_v50  ;;  %v802_v14 = vsel %vm783_vm2, %v757_v62, 0.0  ;;  %v466_v50 = vadd.f32 %v3093_v8, %v3120_v23 }
 0x17b   :  { %v2609_v18 = vpop.eup %2608  ;;  %800 = vadd.xlane.f32.xlu0 %v799_v42  ;;  %803 = vadd.xlane.f32.xlu1 %v802_v14  ;;  %v760_v48 = vmul.f32 %v2607_v46, %v3151_v61 }
 0x17c   :  { %2618 = vtanh.f32 %v695_v45  ;;  %v759_v1 = vmul.f32 %v2609_v18, %v3151_v61  ;;  %v477_v18 = vadd.f32 %v3120_v23, %v3110_v19  ;;  %v485_v19 = vadd.f32 %v3107_v17, %v3120_v23 }
 0x17d   :  { %2620 = vtanh.f32 %v694_v52  ;;  %v602_v20 = vpop.permute.xlu1 %601  ;;  %v598_v24 = vpop.permute.xlu0 %597  ;;  %v811_v34 = vsel %vm783_vm2, %v760_v48, 0.0  ;;  %v490_v17 = vadd.f32 %v3120_v23, %v3115_v22 }
 0x17e   :  { %v2611_v25 = vpop.eup %2610  ;;  %v697_v49 = vadd.f32 %v602_v20, %v445_v12  ;;  %v696_v41 = vadd.f32 %v598_v24, %v442_v3  ;;  %v808_v43 = vsel %vm783_vm2, %v759_v1, 0.0 }
 0x17f   :  { %v2613_v59 = vpop.eup %2612  ;;  %806 = vadd.xlane.f32.xlu0 %v805_v31  ;;  %809 = vadd.xlane.f32.xlu1 %v808_v43  ;;  %v762_v40 = vmul.f32 %v2611_v25, %v3151_v61  ;;  %v482_v25 = vadd.f32 %v3103_v15, %v3120_v23 }
 0x180   :  { %2622 = vtanh.f32 %v697_v49  ;;  %v761_v0 = vmul.f32 %v2613_v59, %v3151_v61 }
 0x181   :  { %2624 = vtanh.f32 %v696_v41  ;;  %v613_v53 = vpop.permute.xlu1 %612  ;;  %v609_v32 = vpop.permute.xlu0 %608  ;;  %v817_v12 = vsel %vm783_vm2, %v762_v40, 0.0 }
 0x182   :  { %v2615_v38 = vpop.eup %2614  ;;  %v699_v58 = vadd.f32 %v613_v53, %v453_v5  ;;  %v698_v39 = vadd.f32 %v609_v32, %v450_v47  ;;  %v814_v57 = vsel %vm783_vm2, %v761_v0, 0.0 }
 0x183   :  { %v2617_v60 = vpop.eup %2616  ;;  %812 = vadd.xlane.f32.xlu0 %v811_v34  ;;  %815 = vadd.xlane.f32.xlu1 %v814_v57  ;;  %v764_v3 = vmul.f32 %v2615_v38, %v3151_v61 }
 0x184   :  { %2626 = vtanh.f32 %v699_v58  ;;  %v763_v9 = vmul.f32 %v2617_v60, %v3151_v61  ;;  %v493_v58 = vadd.f32 %v3120_v23, %v3126_v27 }
 0x185   :  { %2628 = vtanh.f32 %v698_v39  ;;  %v624_v55 = vpop.permute.xlu1 %623  ;;  %v620_v62 = vpop.permute.xlu0 %619  ;;  %v823_v54 = vsel %vm783_vm2, %v764_v3, 0.0 }
 0x186   :  { %v2619_v6 = vpop.eup %2618  ;;  %v701_v11 = vadd.f32 %v624_v55, %v461_v36  ;;  %v700_v42 = vadd.f32 %v620_v62, %v458_v2  ;;  %v820_v46 = vsel %vm783_vm2, %v763_v9, 0.0 }
 0x187   :  { %v2621_v45 = vpop.eup %2620  ;;  %818 = vadd.xlane.f32.xlu0 %v817_v12  ;;  %821 = vadd.xlane.f32.xlu1 %v820_v46  ;;  %v766_v24 = vmul.f32 %v2619_v6, %v3151_v61 }
 0x188   :  { %2630 = vtanh.f32 %v701_v11  ;;  %v765_v8 = vmul.f32 %v2621_v45, %v3151_v61 }
 0x189   :  { %2632 = vtanh.f32 %v700_v42  ;;  %v635_v52 = vpop.permute.xlu1 %634  ;;  %v631_v14 = vpop.permute.xlu0 %630  ;;  %v829_v2 = vsel %vm783_vm2, %v766_v24, 0.0 }
 0x18a   :  { %v2623_v1 = vpop.eup %2622  ;;  %v703_v47 = vadd.f32 %v635_v52, %v469_v13  ;;  %v702_v5 = vadd.f32 %v631_v14, %v466_v50  ;;  %v826_v20 = vsel %vm783_vm2, %v765_v8, 0.0  ;;  %v498_v13 = vadd.f32 %v3113_v21, %v3120_v23 }
 0x18b   :  { %v2625_v48 = vpop.eup %2624  ;;  %824 = vadd.xlane.f32.xlu0 %v823_v54  ;;  %827 = vadd.xlane.f32.xlu1 %v826_v20  ;;  %v768_v31 = vmul.f32 %v2623_v1, %v3151_v61 }
 0x18c   :  { %2634 = vtanh.f32 %v703_v47  ;;  %v767_v16 = vmul.f32 %v2625_v48, %v3151_v61 }
 0x18d   :  { %2636 = vtanh.f32 %v702_v5  ;;  %v646_v49 = vpop.permute.xlu1 %645  ;;  %v642_v41 = vpop.permute.xlu0 %641  ;;  %v835_v38 = vsel %vm783_vm2, %v768_v31, 0.0 }
 0x18e   :  { %v2627_v43 = vpop.eup %2626  ;;  %v705_v59 = vadd.f32 %v646_v49, %v477_v18  ;;  %v704_v0 = vadd.f32 %v642_v41, %v474_v10  ;;  %v832_v53 = vsel %vm783_vm2, %v767_v16, 0.0 }
 0x18f   :  { %v2629_v32 = vpop.eup %2628  ;;  %830 = vadd.xlane.f32.xlu0 %v829_v2  ;;  %833 = vadd.xlane.f32.xlu1 %v832_v53  ;;  %v770_v9 = vmul.f32 %v2627_v43, %v3151_v61 }
 0x190   :  { %2638 = vtanh.f32 %v705_v59  ;;  %v769_v15 = vmul.f32 %v2629_v32, %v3151_v61 }
 0x191   :  { %2640 = vtanh.f32 %v704_v0  ;;  %v657_v34 = vpop.permute.xlu1 %656  ;;  %v653_v36 = vpop.permute.xlu0 %652  ;;  %v841_v42 = vsel %vm783_vm2, %v770_v9, 0.0 }
 0x192   :  { %v2631_v39 = vpop.eup %2630  ;;  %v707_v57 = vadd.f32 %v657_v34, %v485_v19  ;;  %v706_v40 = vadd.f32 %v653_v36, %v482_v25  ;;  %v838_v60 = vsel %vm783_vm2, %v769_v15, 0.0 }
 0x193   :  { %v2633_v50 = vpop.eup %2632  ;;  %836 = vadd.xlane.f32.xlu0 %v835_v38  ;;  %839 = vadd.xlane.f32.xlu1 %v838_v60  ;;  %v772_v27 = vmul.f32 %v2631_v39, %v3151_v61 }
 0x194   :  { %2642 = vtanh.f32 %v707_v57  ;;  %v771_v22 = vmul.f32 %v2633_v50, %v3151_v61  ;;  %v913_v50 = vand.u32 127, %v57_v28 }
 0x195   :  { %2644 = vtanh.f32 %v706_v40  ;;  %v668_v55 = vpop.permute.xlu1 %667  ;;  %v664_v62 = vpop.permute.xlu0 %663  ;;  %v847_v8 = vsel %vm783_vm2, %v772_v27, 0.0 }
 0x196   :  { %v2635_v3 = vpop.eup %2634  ;;  %v709_v6 = vadd.f32 %v668_v55, %v493_v58  ;;  %v708_v11 = vadd.f32 %v664_v62, %v490_v17  ;;  %v844_v12 = vsel %vm783_vm2, %v771_v22, 0.0  ;;  %v918_v55 = vadd.s32 4294967288, %v913_v50 }
 0x197   :  { %v2637_v46 = vpop.eup %2636  ;;  %842 = vadd.xlane.f32.xlu0 %v841_v42  ;;  %845 = vadd.xlane.f32.xlu1 %v844_v12  ;;  %v774_v18 = vmul.f32 %v2635_v3, %v3151_v61 }
 0x198   :  { %2646 = vtanh.f32 %v709_v6  ;;  %v773_v45 = vmul.f32 %v2637_v46, %v3151_v61  ;;  %v3288_v3 = vsub.s32 %v918_v55, %v3012_v29  ;;  %v3291_v6 = vsub.s32 %v913_v50, %v3012_v29 }
 0x199   :  { %2648 = vtanh.f32 %v708_v11  ;;  %v679_v21 = vpop.permute.xlu1 %678  ;;  %v675_v23 = vpop.permute.xlu0 %674  ;;  %v853_v20 = vsel %vm783_vm2, %v774_v18, 0.0 }
 0x19a   :  { %v2639_v10 = vpop.eup %2638  ;;  %v711_v52 = vadd.f32 %v679_v21, %v3124_v26  ;;  %v710_v14 = vadd.f32 %v675_v23, %v498_v13  ;;  %v850_v54 = vsel %vm783_vm2, %v773_v45, 0.0 }
 0x19b   :  { %v2641_v1 = vpop.eup %2640  ;;  %848 = vadd.xlane.f32.xlu0 %v847_v8  ;;  %851 = vadd.xlane.f32.xlu1 %v850_v54  ;;  %v776_v48 = vmul.f32 %v2639_v10, %v3151_v61 }
 0x19c   :  { %2650 = vtanh.f32 %v711_v52  ;;  %v775_v47 = vmul.f32 %v2641_v1, %v3151_v61 }
 0x19d   :  { %2652 = vtanh.f32 %v710_v14  ;;  %v859_v19 = vsel %vm783_vm2, %v776_v48, 0.0 }
 0x19e   :  { %v2643_v5 = vpop.eup %2642  ;;  %v856_v24 = vsel %vm783_vm2, %v775_v47, 0.0 }
 0x19f   :  { %v2645_v26 = vpop.eup %2644  ;;  %854 = vadd.xlane.f32.xlu0 %v853_v20  ;;  %857 = vadd.xlane.f32.xlu1 %v856_v24  ;;  %v778_v41 = vmul.f32 %v2643_v5, %v3151_v61 }
 0x1a0   :  { %v777_v16 = vmul.f32 %v2645_v26, %v3151_v61 }
 0x1a1   :  { %v865_v0 = vsel %vm783_vm2, %v778_v41, 0.0 }
 0x1a2   :  { %v2647_v25 = vpop.eup %2646  ;;  %v862_v49 = vsel %vm783_vm2, %v777_v16, 0.0 }
 0x1a3   :  { %v2649_v31 = vpop.eup %2648  ;;  %860 = vadd.xlane.f32.xlu0 %v859_v19  ;;  %863 = vadd.xlane.f32.xlu1 %v862_v49  ;;  %v780_v53 = vmul.f32 %v2647_v25, %v3151_v61 }
 0x1a4   :  { %v779_v43 = vmul.f32 %v2649_v31, %v3151_v61 }
 0x1a5   :  { %v871_v34 = vsel %vm783_vm2, %v780_v53, 0.0 }
 0x1a6   :  { %v2651_v59 = vpop.eup %2650  ;;  %v868_v2 = vsel %vm783_vm2, %v779_v43, 0.0 }
 0x1a7   :  { %v2653_v32 = vpop.eup %2652  ;;  %866 = vadd.xlane.f32.xlu0 %v865_v0  ;;  %869 = vadd.xlane.f32.xlu1 %v868_v2  ;;  %v782_v15 = vmul.f32 %v2651_v59, %v3151_v61 }
 0x1a8   :  { %v781_v17 = vmul.f32 %v2653_v32, %v3151_v61 }
 0x1a9   :  { %v877_v38 = vsel %vm783_vm2, %v782_v15, 0.0 }
 0x1aa   :  { %v874_v36 = vsel %vm783_vm2, %v781_v17, 0.0 }
 0x1ab   :  { %872 = vadd.xlane.f32.xlu0 %v871_v34  ;;  %875 = vadd.xlane.f32.xlu1 %v874_v36 }
 0x1af   :  { %878 = vadd.xlane.f32.xlu0 %v877_v38 }
 0x1fc   :  { %v3264_v58 = vpop.xlane.xlu0 %785 }
 0x1fd   :  { %v917_v8 = vrot.slane %v3264_v58, %v3291_v6 }
 0x200   :  { %v3266_v39 = vpop.xlane.xlu1 %788  ;;  %v3268_v57 = vpop.xlane.xlu0 %791 }
 0x201   :  { %v922_v46 = vrot.slane %v3266_v39, %v3288_v3  ;;  %v928_v45 = vrot.slane %v3268_v57, %v3291_v6 }
 0x203   :  { %v924_v5 = vsel %vm923_vm3, %v922_v46, %v917_v8 }
 0x204   :  { %v3270_v40 = vpop.xlane.xlu1 %797  ;;  %v3272_v60 = vpop.xlane.xlu0 %794 }
 0x205   :  { %v932_v11 = vrot.slane %v3272_v60, %v3288_v3  ;;  %v937_v21 = vrot.slane %v3270_v40, %v3291_v6 }
 0x207   :  { %v933_v10 = vsel %vm923_vm3, %v932_v11, %v928_v45 }
 0x208   :  { %v3274_v61 = vpop.xlane.xlu1 %803  ;;  %v3276_v9 = vpop.xlane.xlu0 %800  ;;  %v1061_v26 = vsel %vm1060_vm4, %v933_v10, %v924_v5 }
 0x209   :  { %v941_v28 = vrot.slane %v3276_v9, %v3288_v3  ;;  %v946_v52 = vrot.slane %v3274_v61, %v3291_v6 }
 0x20b   :  { %v942_v54 = vsel %vm923_vm3, %v941_v28, %v937_v21 }
 0x20c   :  { %v3279_v22 = vpop.xlane.xlu1 %809  ;;  %v3281_v13 = vpop.xlane.xlu0 %806  ;;  %v1063_v19 = vsel %vm1062_vm5, %v942_v54, %v1061_v26 }
 0x20d   :  { %v950_v29 = vrot.slane %v3281_v13, %v3288_v3  ;;  %v955_v18 = vrot.slane %v3279_v22, %v3291_v6 }
 0x20f   :  { %v951_v20 = vsel %vm923_vm3, %v950_v29, %v946_v52 }
 0x210   :  { %v3283_v62 = vpop.xlane.xlu1 %815  ;;  %v3285_v27 = vpop.xlane.xlu0 %812  ;;  %v1065_v41 = vsel %vm1064_vm6, %v951_v20, %v1063_v19 }
 0x211   :  { %v959_v23 = vrot.slane %v3285_v27, %v3288_v3  ;;  %v964_v24 = vrot.slane %v3283_v62, %v3291_v6 }
 0x213   :  { %v960_v16 = vsel %vm923_vm3, %v959_v23, %v955_v18 }
 0x214   :  { %v3297_v42 = vpop.xlane.xlu1 %821  ;;  %v3299_v12 = vpop.xlane.xlu0 %818  ;;  %v1067_v53 = vsel %vm1066_vm7, %v960_v16, %v1065_v41 }
 0x215   :  { %v968_v14 = vrot.slane %v3299_v12, %v3288_v3  ;;  %v973_v25 = vrot.slane %v3297_v42, %v3291_v6 }
 0x217   :  { %v969_v49 = vsel %vm923_vm3, %v968_v14, %v964_v24 }
 0x218   :  { %v3321_v1 = vpop.xlane.xlu1 %827  ;;  %v3323_v47 = vpop.xlane.xlu0 %824  ;;  %v1069_v32 = vsel %vm1068_vm8, %v969_v49, %v1067_v53 }
 0x219   :  { %v977_v48 = vrot.slane %v3323_v47, %v3288_v3  ;;  %v982_v0 = vrot.slane %v3321_v1, %v3291_v6 }
 0x21b   :  { %v978_v59 = vsel %vm923_vm3, %v977_v48, %v973_v25 }
 0x21c   :  { %v3338_v31 = vpop.xlane.xlu1 %833  ;;  %v3340_v43 = vpop.xlane.xlu0 %830  ;;  %v1071_v17 = vsel %vm1070_vm9, %v978_v59, %v1069_v32 }
 0x21d   :  { %v986_v2 = vrot.slane %v3340_v43, %v3288_v3  ;;  %v991_v48 = vrot.slane %v3338_v31, %v3291_v6 }
 0x21f   :  { %v987_v15 = vsel %vm923_vm3, %v986_v2, %v982_v0 }
 0x220   :  { %v3351_v34 = vpop.xlane.xlu1 %839  ;;  %v3353_v36 = vpop.xlane.xlu0 %836  ;;  %v1073_v38 = vsel %vm1072_vm10, %v987_v15, %v1071_v17 }
 0x221   :  { %v1083_v50 = vsel %vm783_vm2, %v1073_v38, -inf  ;;  %v1000_v54 = vrot.slane %v3351_v34, %v3291_v6  ;;  %v995_v18 = vrot.slane %v3353_v36, %v3288_v3 }
 0x222   :  { %1084 = vmax.xlane.f32.xlu1 %v1083_v50 }
 0x223   :  { %v996_v59 = vsel %vm923_vm3, %v995_v18, %v991_v48 }
 0x224   :  { %v3357_v55 = vpop.xlane.xlu1 %845  ;;  %v3359_v11 = vpop.xlane.xlu0 %842 }
 0x225   :  { %v1004_v8 = vrot.slane %v3359_v11, %v3288_v3  ;;  %v1009_v20 = vrot.slane %v3357_v55, %v3291_v6 }
 0x227   :  { %v1005_v26 = vsel %vm923_vm3, %v1004_v8, %v1000_v54 }
 0x228   :  { %v3361_v28 = vpop.xlane.xlu1 %851  ;;  %v3363_v46 = vpop.xlane.xlu0 %848  ;;  %v1074_v32 = vsel %vm1060_vm4, %v1005_v26, %v996_v59 }
 0x229   :  { %v1013_v10 = vrot.slane %v3363_v46, %v3288_v3  ;;  %v1018_v16 = vrot.slane %v3361_v28, %v3291_v6 }
 0x22b   :  { %v1014_v19 = vsel %vm923_vm3, %v1013_v10, %v1009_v20 }
 0x22c   :  { %v3365_v45 = vpop.xlane.xlu1 %857  ;;  %v3367_v29 = vpop.xlane.xlu0 %854  ;;  %v1075_v50 = vsel %vm1062_vm5, %v1014_v19, %v1074_v32 }
 0x22d   :  { %v1022_v5 = vrot.slane %v3367_v29, %v3288_v3  ;;  %v1027_v49 = vrot.slane %v3365_v45, %v3291_v6 }
 0x22f   :  { %v1023_v0 = vsel %vm923_vm3, %v1022_v5, %v1018_v16 }
 0x230   :  { %v3369_v21 = vpop.xlane.xlu1 %863  ;;  %v3371_v23 = vpop.xlane.xlu0 %860  ;;  %v1076_v10 = vsel %vm1064_vm6, %v1023_v0, %v1075_v50 }
 0x231   :  { %v1031_v24 = vrot.slane %v3371_v23, %v3288_v3  ;;  %v1036_v2 = vrot.slane %v3369_v21, %v3291_v6 }
 0x233   :  { %v1032_v15 = vsel %vm923_vm3, %v1031_v24, %v1027_v49 }
 0x234   :  { %v3377_v52 = vpop.xlane.xlu1 %869  ;;  %v3379_v14 = vpop.xlane.xlu0 %866  ;;  %v1077_v24 = vsel %vm1066_vm7, %v1032_v15, %v1076_v10 }
 0x235   :  { %v1040_v25 = vrot.slane %v3379_v14, %v3288_v3  ;;  %v1045_v17 = vrot.slane %v3377_v52, %v3291_v6 }
 0x237   :  { %v1041_v8 = vsel %vm923_vm3, %v1040_v25, %v1036_v2 }
 0x238   :  { %v3401_v41 = vpop.xlane.xlu0 %872  ;;  %v3413_v38 = vpop.xlane.xlu1 %875  ;;  %v1078_v48 = vsel %vm1068_vm8, %v1041_v8, %v1077_v24 }
 0x239   :  { %v1049_v53 = vrot.slane %v3401_v41, %v3288_v3  ;;  %v1054_v5 = vrot.slane %v3413_v38, %v3291_v6 }
 0x23b   :  { %v1050_v18 = vsel %vm923_vm3, %v1049_v53, %v1045_v17 }
 0x23c   :  { %v3418_v54 = vpop.xlane.xlu0 %878  ;;  %v1079_v16 = vsel %vm1070_vm9, %v1050_v18, %v1078_v48 }
 0x23d   :  { %v1058_v20 = vrot.slane %v3418_v54, %v3288_v3 }
 0x23f   :  { %v1059_v26 = vsel %vm923_vm3, %v1058_v20, %v1054_v5 }
 0x240   :  { %v1080_v25 = vsel %vm1072_vm10, %v1059_v26, %v1079_v16 }
 0x241   :  { %v1086_v19 = vsel %vm783_vm2, %v1080_v25, -inf }
 0x242   :  { %1087 = vmax.xlane.f32.xlu0 %v1086_v19 }
 0x2af   :  { %v1085_v49 = vpop.xlane.xlu1 %1084 }
 0x2b0   :  { %v1094_v59 = vrot.slane %v1085_v49, %v3024_v35  ;;  %v1098_v0 = vrot.slane %v1085_v49, %v3015_v30  ;;  %v1106_v2 = vrot.slane %v1085_v49, %v3051_v51  ;;  %v1110_v17 = vrot.slane %v1085_v49, %v3061_v56 }
 0x2b1   :  { %v1102_v18 = vrot.slane %v1085_v49, %v3037_v44  ;;  %v1114_v24 = vrot.slane %v1085_v49, %v3075_v63 }
 0x2b2   :  { %v1171_v53 = vsub.f32 %v3264_v58, %v1094_v59  ;;  %v1172_v32 = vsub.f32 %v3266_v39, %v1094_v59  ;;  %v1173_v15 = vsub.f32 %v3268_v57, %v1098_v0  ;;  %v1177_v50 = vsub.f32 %v3274_v61, %v1106_v2 }
 0x2b3   :  { %v1174_v5 = vsub.f32 %v3272_v60, %v1098_v0  ;;  %v1179_v58 = vsub.f32 %v3279_v22, %v1110_v17  ;;  %v1175_v57 = vsub.f32 %v3270_v40, %v1102_v18  ;;  %v1118_v61 = vrot.slane %v1085_v49, %v3085_v4 }
 0x2b4   :  { %v1203_v8 = vmul.f32 1.442695, %v1171_v53  ;;  %v1205_v10 = vmul.f32 1.442695, %v1172_v32  ;;  %v1207_v20 = vmul.f32 1.442695, %v1173_v15  ;;  %v1181_v26 = vsub.f32 %v3283_v62, %v1114_v24 }
 0x2b5   :  { %v1215_v39 = vmul.f32 1.442695, %v1177_v50  ;;  %v1209_v48 = vmul.f32 1.442695, %v1174_v5  ;;  %v1219_v16 = vmul.f32 1.442695, %v1179_v58  ;;  %v1176_v60 = vsub.f32 %v3276_v9, %v1102_v18 }
 0x2b6   :  { %2654 = vpow2.f32 %v1203_v8  ;;  %v1211_v25 = vmul.f32 1.442695, %v1175_v57  ;;  %v1122_v59 = vrot.slane %v1085_v49, %v3091_v7  ;;  %v1183_v22 = vsub.f32 %v3297_v42, %v1118_v61 }
 0x2b7   :  { %2656 = vpow2.f32 %v1205_v10  ;;  %v1223_v40 = vmul.f32 1.442695, %v1181_v26  ;;  %v1178_v62 = vsub.f32 %v3281_v13, %v1106_v2  ;;  %v1213_v53 = vmul.f32 1.442695, %v1176_v60 }
 0x2b8   :  { %2658 = vpow2.f32 %v1207_v20  ;;  %v1185_v32 = vsub.f32 %v3321_v1, %v1122_v59  ;;  %v1227_v49 = vmul.f32 1.442695, %v1183_v22  ;;  %v1180_v15 = vsub.f32 %v3285_v27, %v1110_v17 }
 0x2b9   :  { %2660 = vpow2.f32 %v1215_v39  ;;  %v1217_v50 = vmul.f32 1.442695, %v1178_v62  ;;  %v1182_v1 = vsub.f32 %v3299_v12, %v1114_v24  ;;  %v1184_v5 = vsub.f32 %v3323_v47, %v1118_v61 }
 0x2ba   :  { %2662 = vpow2.f32 %v1209_v48  ;;  %v1231_v2 = vmul.f32 1.442695, %v1185_v32  ;;  %v1221_v10 = vmul.f32 1.442695, %v1180_v15  ;;  %v1186_v24 = vsub.f32 %v3340_v43, %v1122_v59 }
 0x2bb   :  { %2664 = vpow2.f32 %v1219_v16  ;;  %v1225_v20 = vmul.f32 1.442695, %v1182_v1  ;;  %v1229_v48 = vmul.f32 1.442695, %v1184_v5 }
 0x2bc   :  { %2666 = vpow2.f32 %v1211_v25  ;;  %v1233_v16 = vmul.f32 1.442695, %v1186_v24 }
 0x2bd   :  { %2668 = vpow2.f32 %v1223_v40 }
 0x2be   :  { %2670 = vpow2.f32 %v1213_v53 }
 0x2bf   :  { %2672 = vpow2.f32 %v1227_v49 }
 0x2c0   :  { %v3447_v19 = vpop.eup %2654  ;;  %2674 = vpow2.f32 %v1217_v50 }
 0x2c1   :  { %v3451_v0 = vpop.eup %2656  ;;  %1300 = vperm.xlu1 %2537, %v3447_v19   ;;  %2676 = vpow2.f32 %v1231_v2 }
 0x2c2   :  { %1303 = vperm.xlu0 %2538, %v3451_v0   ;;  %v3456_v9 = vpop.eup %2658  ;;  %2678 = vpow2.f32 %v1221_v10 }
 0x2c3   :  { %v3460_v42 = vpop.eup %2660  ;;  %2680 = vpow2.f32 %v1225_v20 }
 0x2c4   :  { %v3464_v13 = vpop.eup %2662  ;;  %2682 = vpow2.f32 %v1229_v48 }
 0x2c5   :  { %1306 = vperm.xlu1 %2537, %v3456_v9   ;;  %v3467_v8 = vpop.eup %2664  ;;  %2684 = vpow2.f32 %v1233_v16 }
 0x2c6   :  { %1318 = vperm.xlu0 %2538, %v3460_v42   ;;  %v3471_v18 = vpop.eup %2666 }
 0x2c7   :  { %v3474_v17 = vpop.eup %2668 }
 0x2c8   :  { %v3481_v12 = vpop.eup %2670 }
 0x2c9   :  { %1309 = vperm.xlu1 %2537, %v3464_v13   ;;  %v3486_v57 = vpop.eup %2672 }
 0x2ca   :  { %1324 = vperm.xlu0 %2538, %v3467_v8   ;;  %v3494_v26 = vpop.eup %2674 }
 0x2cb   :  { %v3498_v60 = vpop.eup %2676 }
 0x2cd   :  { %1312 = vperm.xlu1 %2537, %v3471_v18  }
 0x2ce   :  { %1330 = vperm.xlu0 %2538, %v3474_v17  }
 0x2cf   :  { %v1088_v27 = vpop.xlane.xlu0 %1087 }
 0x2d0   :  { %v3478_v58 = vrot.slane %v1088_v27, %v3037_v44  ;;  %v1126_v39 = vrot.slane %v1088_v27, %v3024_v35  ;;  %v3489_v47 = vrot.slane %v1088_v27, %v3051_v51  ;;  %v3501_v25 = vrot.slane %v1088_v27, %v3061_v56 }
 0x2d1   :  { %1315 = vperm.xlu1 %2537, %v3481_v12   ;;  %v1130_v40 = vrot.slane %v1088_v27, %v3015_v30  ;;  %v1146_v53 = vrot.slane %v1088_v27, %v3075_v63 }
 0x2d2   :  { %v1191_v61 = vsub.f32 %v3357_v55, %v3478_v58  ;;  %1336 = vperm.xlu0 %2538, %v3486_v57   ;;  %v1187_v43 = vsub.f32 %v3338_v31, %v1126_v39  ;;  %v1193_v59 = vsub.f32 %v3361_v28, %v3489_v47  ;;  %v3506_v55 = vpop.eup %2678  ;;  %v1188_v31 = vsub.f32 %v3353_v36, %v1126_v39 }
 0x2d3   :  { %v1195_v32 = vsub.f32 %v3365_v45, %v3501_v25  ;;  %v3514_v49 = vpop.eup %2680  ;;  %v1189_v15 = vsub.f32 %v3351_v34, %v1130_v40  ;;  %v1150_v36 = vrot.slane %v1088_v27, %v3085_v4  ;;  %v1197_v2 = vsub.f32 %v3369_v21, %v1146_v53 }
 0x2d4   :  { %v1243_v22 = vmul.f32 1.442695, %v1191_v61  ;;  %v1235_v62 = vmul.f32 1.442695, %v1187_v43  ;;  %v1247_v28 = vmul.f32 1.442695, %v1193_v59  ;;  %v3520_v10 = vpop.eup %2682  ;;  %v1190_v45 = vsub.f32 %v3359_v11, %v1130_v40 }
 0x2d5   :  { %1321 = vperm.xlu1 %2537, %v3494_v26   ;;  %v1237_v50 = vmul.f32 1.442695, %v1188_v31  ;;  %v1251_v1 = vmul.f32 1.442695, %v1195_v32  ;;  %v1239_v5 = vmul.f32 1.442695, %v1189_v15  ;;  %v1154_v34 = vrot.slane %v1088_v27, %v3091_v7  ;;  %v3526_v39 = vpop.eup %2684 }
 0x2d6   :  { %1342 = vperm.xlu0 %2538, %v3498_v60   ;;  %2686 = vpow2.f32 %v1243_v22  ;;  %v1199_v20 = vsub.f32 %v3377_v52, %v1150_v36  ;;  %v1255_v24 = vmul.f32 1.442695, %v1197_v2  ;;  %v1192_v21 = vsub.f32 %v3363_v46, %v3478_v58 }
 0x2d7   :  { %2688 = vpow2.f32 %v1235_v62  ;;  %v1241_v61 = vmul.f32 1.442695, %v1190_v45  ;;  %v1201_v11 = vsub.f32 %v3413_v38, %v1154_v34  ;;  %v1194_v46 = vsub.f32 %v3367_v29, %v3489_v47 }
 0x2d8   :  { %2690 = vpow2.f32 %v1247_v28  ;;  %v1259_v27 = vmul.f32 1.442695, %v1199_v20  ;;  %v1245_v43 = vmul.f32 1.442695, %v1192_v21  ;;  %v1196_v22 = vsub.f32 %v3371_v23, %v3501_v25 }
 0x2d9   :  { %1327 = vperm.xlu1 %2537, %v3506_v55   ;;  %2692 = vpow2.f32 %v1237_v50  ;;  %v1263_v58 = vmul.f32 1.442695, %v1201_v11  ;;  %v1249_v40 = vmul.f32 1.442695, %v1194_v46  ;;  %v1198_v29 = vsub.f32 %v3379_v14, %v1146_v53 }
 0x2da   :  { %2694 = vpow2.f32 %v1251_v1  ;;  %v1253_v47 = vmul.f32 1.442695, %v1196_v22  ;;  %v1200_v23 = vsub.f32 %v3401_v41, %v1150_v36  ;;  %v1202_v14 = vsub.f32 %v3418_v54, %v1154_v34 }
 0x2db   :  { %2696 = vpow2.f32 %v1239_v5  ;;  %v1257_v25 = vmul.f32 1.442695, %v1198_v29 }
 0x2dc   :  { %2698 = vpow2.f32 %v1255_v24  ;;  %v1261_v53 = vmul.f32 1.442695, %v1200_v23  ;;  %v1265_v41 = vmul.f32 1.442695, %v1202_v14 }
 0x2dd   :  { %1333 = vperm.xlu1 %2537, %v3514_v49   ;;  %2700 = vpow2.f32 %v1241_v61 }
 0x2de   :  { %2702 = vpow2.f32 %v1259_v27 }
 0x2df   :  { %2704 = vpow2.f32 %v1245_v43 }
 0x2e0   :  { %v3528_v48 = vpop.eup %2686  ;;  %2706 = vpow2.f32 %v1263_v58 }
 0x2e1   :  { %1339 = vperm.xlu1 %2537, %v3520_v10   ;;  %1360 = vperm.xlu0 %2538, %v3528_v48   ;;  %v3535_v52 = vpop.eup %2688  ;;  %2708 = vpow2.f32 %v1249_v40 }
 0x2e2   :  { %v3537_v16 = vpop.eup %2690  ;;  %2710 = vpow2.f32 %v1253_v47 }
 0x2e3   :  { %v3543_v59 = vpop.eup %2692  ;;  %2712 = vpow2.f32 %v1257_v25 }
 0x2e4   :  { %v3545_v38 = vpop.eup %2694  ;;  %2714 = vpow2.f32 %v1261_v53 }
 0x2e5   :  { %1345 = vperm.xlu1 %2537, %v3526_v39   ;;  %1366 = vperm.xlu0 %2538, %v3537_v16   ;;  %v3551_v31 = vpop.eup %2696  ;;  %2716 = vpow2.f32 %v1265_v41 }
 0x2e6   :  { %v3553_v62 = vpop.eup %2698 }
 0x2e7   :  { %v3558_v32 = vpop.eup %2700 }
 0x2e8   :  { %v3560_v28 = vpop.eup %2702 }
 0x2e9   :  { %1348 = vperm.xlu1 %2537, %v3535_v52   ;;  %1372 = vperm.xlu0 %2538, %v3545_v38   ;;  %v3565_v15 = vpop.eup %2704 }
 0x2ea   :  { %v3567_v50 = vpop.eup %2706 }
 0x2eb   :  { %3973 = vst [vmem:[#allocation10_spill] sm:$0xff] %v3567_v50  ;;  %v3572_v2 = vpop.eup %2708 }
 0x2ec   :  { %v3575_v36 = vpop.eup %2710 }
 0x2ed   :  { %1351 = vperm.xlu1 %2537, %v3543_v59   ;;  %1378 = vperm.xlu0 %2538, %v3553_v62   ;;  %v3578_v1 = vpop.eup %2712 }
 0x2ee   :  { %v3581_v45 = vpop.eup %2714 }
 0x2ef   :  { %v3584_v54 = vpop.eup %2716 }
 0x2f0   :  { %3974 = vst [vmem:[#allocation11_spill] sm:$0xff] %v3584_v54 }
 0x2f1   :  { %1354 = vperm.xlu1 %2537, %v3551_v31   ;;  %1384 = vperm.xlu0 %2538, %v3560_v28  }
 0x2f5   :  { %1357 = vperm.xlu1 %2537, %v3558_v32   ;;  %1390 = vperm.xlu0 %2538, %v3567_v50  }
 0x2f9   :  { %1363 = vperm.xlu1 %2537, %v3565_v15  }
 0x2fd   :  { %1369 = vperm.xlu1 %2537, %v3572_v2  }
 0x301   :  { %1375 = vperm.xlu1 %2537, %v3575_v36  }
 0x305   :  { %1381 = vperm.xlu1 %2537, %v3578_v1  }
 0x309   :  { %1387 = vperm.xlu1 %2537, %v3581_v45  }
 0x30d   :  { %1393 = vperm.xlu1 %2537, %v3584_v54  }
 0x340   :  { %v1301_v5 = vpop.permute.xlu1 %1300 }
 0x341   :  { %v1304_v34 = vpop.permute.xlu0 %1303  ;;  %v1398_v23 = vrot.slane %v1301_v5, %v3291_v6 }
 0x342   :  { %v1402_v25 = vrot.slane %v1304_v34, %v3288_v3 }
 0x344   :  { %v1307_v20 = vpop.permute.xlu1 %1306  ;;  %v1403_v34 = vsel %vm923_vm3, %v1402_v25, %v1398_v23 }
 0x345   :  { %v1319_v21 = vpop.permute.xlu0 %1318  ;;  %v1407_v14 = vrot.slane %v1307_v20, %v3291_v6 }
 0x346   :  { %v1425_v33 = vrot.slane %v1319_v21, %v3291_v6 }
 0x348   :  { %v1310_v24 = vpop.permute.xlu1 %1309 }
 0x349   :  { %v1325_v11 = vpop.permute.xlu0 %1324  ;;  %v1411_v22 = vrot.slane %v1310_v24, %v3288_v3 }
 0x34a   :  { %v1434_v50 = vrot.slane %v1325_v11, %v3291_v6 }
 0x34b   :  { %v1412_v24 = vsel %vm923_vm3, %v1411_v22, %v1407_v14 }
 0x34c   :  { %v1313_v61 = vpop.permute.xlu1 %1312 }
 0x34d   :  { %v1331_v46 = vpop.permute.xlu0 %1330  ;;  %v1416_v41 = vrot.slane %v1313_v61, %v3291_v6 }
 0x34e   :  { %v1443_v20 = vrot.slane %v1331_v46, %v3291_v6 }
 0x350   :  { %v1316_v27 = vpop.permute.xlu1 %1315 }
 0x351   :  { %v1420_v40 = vrot.slane %v1316_v27, %v3288_v3  ;;  %v1337_v29 = vpop.permute.xlu0 %1336 }
 0x352   :  { %v1452_v21 = vrot.slane %v1337_v29, %v3291_v6 }
 0x353   :  { %v1421_v5 = vsel %vm923_vm3, %v1420_v40, %v1416_v41 }
 0x354   :  { %v1322_v43 = vpop.permute.xlu1 %1321 }
 0x355   :  { %v1429_v53 = vrot.slane %v1322_v43, %v3288_v3  ;;  %v1343_v22 = vpop.permute.xlu0 %1342 }
 0x357   :  { %v1430_v43 = vsel %vm923_vm3, %v1429_v53, %v1425_v33  ;;  %v1461_v33 = vrot.slane %v1343_v22, %v3291_v6 }
 0x358   :  { %v1328_v58 = vpop.permute.xlu1 %1327 }
 0x359   :  { %v1438_v37 = vrot.slane %v1328_v58, %v3288_v3  ;;  %v1539_v58 = vsel %vm1060_vm4, %v1412_v24, %v1403_v34 }
 0x35a   :  { %v1540_v11 = vsel %vm1062_vm5, %v1421_v5, %v1539_v58 }
 0x35b   :  { %v1541_v14 = vsel %vm1064_vm6, %v1430_v43, %v1540_v11 }
 0x35c   :  { %v1334_v47 = vpop.permute.xlu1 %1333 }
 0x35d   :  { %v1447_v27 = vrot.slane %v1334_v47, %v3288_v3  ;;  %v1439_v47 = vsel %vm923_vm3, %v1438_v37, %v1434_v50 }
 0x35f   :  { %v1448_v40 = vsel %vm923_vm3, %v1447_v27, %v1443_v20 }
 0x360   :  { %v1340_v54 = vpop.permute.xlu1 %1339  ;;  %v1361_v27 = vpop.permute.xlu0 %1360 }
 0x361   :  { %v1456_v61 = vrot.slane %v1340_v54, %v3288_v3  ;;  %v1542_v54 = vsel %vm1066_vm7, %v1439_v47, %v1541_v14 }
 0x362   :  { %v1543_v29 = vsel %vm1068_vm8, %v1448_v40, %v1542_v54 }
 0x363   :  { %v1457_v23 = vsel %vm923_vm3, %v1456_v61, %v1452_v21 }
 0x364   :  { %v1346_v46 = vpop.permute.xlu1 %1345  ;;  %v1544_v37 = vsel %vm1070_vm9, %v1457_v23, %v1543_v29  ;;  %v1367_v20 = vpop.permute.xlu0 %1366 }
 0x365   :  { %v1465_v25 = vrot.slane %v1346_v46, %v3288_v3 }
 0x367   :  { %v1466_v53 = vsel %vm923_vm3, %v1465_v25, %v1461_v33  ;;  %v1488_v25 = vrot.slane %v1361_v27, %v3291_v6 }
 0x368   :  { %v1349_v50 = vpop.permute.xlu1 %1348  ;;  %v1545_v41 = vsel %vm1072_vm10, %v1466_v53, %v1544_v37  ;;  %v1373_v61 = vpop.permute.xlu0 %1372  ;;  %v1497_v53 = vrot.slane %v1367_v20, %v3291_v6 }
 0x369   :  { %v1555_v24 = vsel %vm783_vm2, %v1545_v41, 0.0  ;;  %v1470_v37 = vrot.slane %v1349_v50, %v3291_v6 }
 0x36a   :  { %1556 = vadd.xlane.f32.xlu0 %v1555_v24 }
 0x36c   :  { %v1352_v5 = vpop.permute.xlu1 %1351  ;;  %v1379_v22 = vpop.permute.xlu0 %1378 }
 0x36d   :  { %v1474_v46 = vrot.slane %v1352_v5, %v3288_v3 }
 0x370   :  { %v1355_v34 = vpop.permute.xlu1 %1354  ;;  %v1385_v40 = vpop.permute.xlu0 %1384 }
 0x371   :  { %v1479_v33 = vrot.slane %v1355_v34, %v3291_v6  ;;  %v1475_v34 = vsel %vm923_vm3, %v1474_v46, %v1470_v37  ;;  %v1524_v20 = vrot.slane %v1385_v40, %v3291_v6 }
 0x374   :  { %v1358_v43 = vpop.permute.xlu1 %1357 }
 0x375   :  { %v1483_v11 = vrot.slane %v1358_v43, %v3288_v3  ;;  %v1506_v43 = vrot.slane %v1373_v61, %v3291_v6 }
 0x377   :  { %v1484_v41 = vsel %vm923_vm3, %v1483_v11, %v1479_v33  ;;  %v1391_v11 = vpop.permute.xlu0 %1390 }
 0x378   :  { %v1364_v58 = vpop.permute.xlu1 %1363  ;;  %v1546_v50 = vsel %vm1060_vm4, %v1484_v41, %v1475_v34 }
 0x379   :  { %v1492_v14 = vrot.slane %v1364_v58, %v3288_v3 }
 0x37b   :  { %v1493_v5 = vsel %vm923_vm3, %v1492_v14, %v1488_v25 }
 0x37c   :  { %v1370_v21 = vpop.permute.xlu1 %1369  ;;  %v1547_v61 = vsel %vm1062_vm5, %v1493_v5, %v1546_v50 }
 0x37d   :  { %v1501_v54 = vrot.slane %v1370_v21, %v3288_v3  ;;  %v1515_v21 = vrot.slane %v1379_v22, %v3291_v6 }
 0x37f   :  { %v1502_v27 = vsel %vm923_vm3, %v1501_v54, %v1497_v53  ;;  %v1533_v54 = vrot.slane %v1391_v11, %v3291_v6 }
 0x380   :  { %v1376_v47 = vpop.permute.xlu1 %1375  ;;  %v1548_v33 = vsel %vm1064_vm6, %v1502_v27, %v1547_v61 }
 0x381   :  { %v1510_v29 = vrot.slane %v1376_v47, %v3288_v3 }
 0x384   :  { %v1382_v23 = vpop.permute.xlu1 %1381 }
 0x385   :  { %v1519_v24 = vrot.slane %v1382_v23, %v3288_v3  ;;  %v1511_v23 = vsel %vm923_vm3, %v1510_v29, %v1506_v43 }
 0x386   :  { %v1549_v25 = vsel %vm1066_vm7, %v1511_v23, %v1548_v33 }
 0x387   :  { %v1520_v14 = vsel %vm923_vm3, %v1519_v24, %v1515_v21 }
 0x388   :  { %v1388_v58 = vpop.permute.xlu1 %1387  ;;  %v1550_v53 = vsel %vm1068_vm8, %v1520_v14, %v1549_v25 }
 0x389   :  { %v1528_v47 = vrot.slane %v1388_v58, %v3288_v3 }
 0x38b   :  { %v1529_v46 = vsel %vm923_vm3, %v1528_v47, %v1524_v20 }
 0x38c   :  { %v1394_v22 = vpop.permute.xlu1 %1393  ;;  %v1551_v29 = vsel %vm1070_vm9, %v1529_v46, %v1550_v53 }
 0x38d   :  { %v1537_v40 = vrot.slane %v1394_v22, %v3288_v3 }
 0x38f   :  { %v1538_v37 = vsel %vm923_vm3, %v1537_v40, %v1533_v54 }
 0x390   :  { %v1552_v41 = vsel %vm1072_vm10, %v1538_v37, %v1551_v29 }
 0x391   :  { %v1558_v24 = vsel %vm783_vm2, %v1552_v41, 0.0 }
 0x392   :  { %1559 = vadd.xlane.f32.xlu1 %v1558_v24 }
 0x3f7   :  { %v1557_v43 = vpop.xlane.xlu0 %1556 }
 0x3f8   :  { %v1566_v5 = vrot.slane %v1557_v43, %v3024_v35  ;;  %v1570_v6 = vrot.slane %v1557_v43, %v3015_v30  ;;  %v1574_v3 = vrot.slane %v1557_v43, %v3037_v44  ;;  %v1578_v58 = vrot.slane %v1557_v43, %v3051_v51 }
 0x3f9   :  { %v1582_v21 = vrot.slane %v1557_v43, %v3061_v56  ;;  %v1586_v50 = vrot.slane %v1557_v43, %v3075_v63  ;;  %v1590_v14 = vrot.slane %v1557_v43, %v3085_v4  ;;  %v1594_v46 = vrot.slane %v1557_v43, %v3091_v7 }
 0x3fa   :  { %2718 = vrcp.f32 %v1566_v5 }
 0x3fb   :  { %2720 = vrcp.f32 %v1570_v6 }
 0x3fc   :  { %2722 = vrcp.f32 %v1574_v3 }
 0x3fd   :  { %2724 = vrcp.f32 %v1578_v58 }
 0x3fe   :  { %2726 = vrcp.f32 %v1582_v21 }
 0x3ff   :  { %2728 = vrcp.f32 %v1586_v50 }
 0x400   :  { %2730 = vrcp.f32 %v1590_v14 }
 0x401   :  { %2732 = vrcp.f32 %v1594_v46 }
 0x404   :  { %v2719_v34 = vpop.eup %2718 }
 0x405   :  { %v1645_v27 = vmul.f32 %v2719_v34, %v3451_v0  ;;  %v1644_v47 = vmul.f32 %v2719_v34, %v3447_v19  ;;  %v2721_v20 = vpop.eup %2720 }
 0x406   :  { %v1648_v11 = vmul.f32 %v2721_v20, %v3464_v13  ;;  %v1647_v23 = vmul.f32 %v2721_v20, %v3456_v9  ;;  %v2723_v61 = vpop.eup %2722 }
 0x407   :  { %1730 = vperm.xlu1 %2537, %v1645_v27   ;;  %1725 = vperm.xlu0 %2538, %v1644_v47   ;;  %v1651_v0 = vmul.f32 %v2723_v61, %v3481_v12  ;;  %v1650_v19 = vmul.f32 %v2723_v61, %v3471_v18  ;;  %v2725_v33 = vpop.eup %2724 }
 0x408   :  { %v1654_v13 = vmul.f32 %v2725_v33, %v3494_v26  ;;  %v1653_v9 = vmul.f32 %v2725_v33, %v3460_v42  ;;  %v2727_v22 = vpop.eup %2726 }
 0x409   :  { %v1657_v54 = vmul.f32 %v2727_v22, %v3506_v55  ;;  %v1656_v12 = vmul.f32 %v2727_v22, %v3467_v8  ;;  %v2729_v25 = vpop.eup %2728  ;;  %v2775_v22 = vld [vmem:[%s3957_s1 + $0x8] sm:$0xff]  }
 0x40a   :  { %v1660_v18 = vmul.f32 %v2729_v25, %v3514_v49  ;;  %v1659_v40 = vmul.f32 %v2729_v25, %v3474_v17  ;;  %v2731_v53 = vpop.eup %2730 }
 0x40b   :  { %1740 = vperm.xlu1 %2537, %v1648_v11   ;;  %1735 = vperm.xlu0 %2538, %v1647_v23   ;;  %v1663_v42 = vmul.f32 %v2731_v53, %v3520_v10  ;;  %v1662_v26 = vmul.f32 %v2731_v53, %v3486_v57  ;;  %v2733_v37 = vpop.eup %2732  ;;  %v2774_v23 = vld [vmem:[%s3957_s1] sm:$0xff]  }
 0x40c   :  { %v1666_v41 = vmul.f32 %v2733_v37, %v3526_v39  ;;  %v1665_v49 = vmul.f32 %v2733_v37, %v3498_v60  ;;  %v1692_v61 = vunpack.c.h.bf16 %v2774_v23  ;;  %v1691_v14 = vunpack.c.l.bf16 %v2774_v23 }
 0x40f   :  { %1750 = vperm.xlu1 %2537, %v1651_v0   ;;  %1745 = vperm.xlu0 %2538, %v1650_v19  }
 0x413   :  { %1760 = vperm.xlu1 %2537, %v1654_v13   ;;  %1755 = vperm.xlu0 %2538, %v1653_v9  }
 0x417   :  { %1770 = vperm.xlu1 %2537, %v1657_v54   ;;  %1765 = vperm.xlu0 %2538, %v1656_v12   ;;  %v1694_v54 = vunpack.c.h.bf16 %v2775_v22  ;;  %v1693_v12 = vunpack.c.l.bf16 %v2775_v22 }
 0x41b   :  { %1780 = vperm.xlu1 %2537, %v1660_v18   ;;  %1775 = vperm.xlu0 %2538, %v1659_v40  }
 0x41f   :  { %v1560_v29 = vpop.xlane.xlu1 %1559  ;;  %1790 = vperm.xlu1 %2537, %v1663_v42   ;;  %1785 = vperm.xlu0 %2538, %v1662_v26  }
 0x420   :  { %v1598_v8 = vrot.slane %v1560_v29, %v3024_v35  ;;  %v1602_v55 = vrot.slane %v1560_v29, %v3015_v30  ;;  %v1606_v17 = vrot.slane %v1560_v29, %v3037_v44  ;;  %v1610_v57 = vrot.slane %v1560_v29, %v3051_v51 }
 0x421   :  { %v1614_v24 = vrot.slane %v1560_v29, %v3061_v56  ;;  %v1618_v60 = vrot.slane %v1560_v29, %v3075_v63  ;;  %v1622_v51 = vrot.slane %v1560_v29, %v3085_v4  ;;  %v1626_v63 = vrot.slane %v1560_v29, %v3091_v7 }
 0x422   :  { %2734 = vrcp.f32 %v1598_v8 }
 0x423   :  { %1800 = vperm.xlu1 %2537, %v1666_v41   ;;  %1795 = vperm.xlu0 %2538, %v1665_v49   ;;  %2736 = vrcp.f32 %v1602_v55  ;;  %v2776_v55 = vld [vmem:[%s3957_s1 + $0x10] sm:$0xff]  }
 0x424   :  { %2738 = vrcp.f32 %v1606_v17  ;;  %v1696_v41 = vunpack.c.h.bf16 %v2776_v55  ;;  %v1695_v49 = vunpack.c.l.bf16 %v2776_v55 }
 0x425   :  { %2740 = vrcp.f32 %v1610_v57 }
 0x426   :  { %2742 = vrcp.f32 %v1614_v24 }
 0x427   :  { %2744 = vrcp.f32 %v1618_v60  ;;  %v2777_v60 = vld [vmem:[%s3957_s1 + $0x18] sm:$0xff]  }
 0x428   :  { %2746 = vrcp.f32 %v1622_v51 }
 0x429   :  { %2748 = vrcp.f32 %v1626_v63 }
 0x42c   :  { %v2735_v10 = vpop.eup %2734 }
 0x42d   :  { %v1669_v43 = vmul.f32 %v2735_v10, %v3543_v59  ;;  %v1668_v30 = vmul.f32 %v2735_v10, %v3535_v52  ;;  %v2737_v39 = vpop.eup %2736 }
 0x42e   :  { %v1672_v5 = vmul.f32 %v2737_v39, %v3558_v32  ;;  %v1671_v44 = vmul.f32 %v2737_v39, %v3551_v31  ;;  %v2739_v6 = vpop.eup %2738 }
 0x42f   :  { %1810 = vperm.xlu1 %2537, %v1669_v43   ;;  %1805 = vperm.xlu0 %2538, %v1668_v30   ;;  %v1675_v56 = vmul.f32 %v2739_v6, %v3565_v15  ;;  %v1674_v52 = vmul.f32 %v2739_v6, %v3528_v48  ;;  %v2741_v59 = vpop.eup %2740 }
 0x430   :  { %v1678_v32 = vmul.f32 %v2741_v59, %v3572_v2  ;;  %v1677_v31 = vmul.f32 %v2741_v59, %v3537_v16  ;;  %v2743_v3 = vpop.eup %2742 }
 0x431   :  { %v1681_v4 = vmul.f32 %v2743_v3, %v3575_v36  ;;  %v1680_v15 = vmul.f32 %v2743_v3, %v3545_v38  ;;  %v2745_v58 = vpop.eup %2744  ;;  %v3975_v36 = vld [vmem:[#allocation11_spill] sm:$0xff]  ;;  %v3976_v38 = vld [vmem:[#allocation10_spill] sm:$0xff] }
 0x432   :  { %v1684_v48 = vmul.f32 %v2745_v58, %v3578_v1  ;;  %v1683_v34 = vmul.f32 %v2745_v58, %v3553_v62  ;;  %v2747_v7 = vpop.eup %2746  ;;  %v2570_v62 = vld [vmem:[%s3964_s8] sm:$0xff]   ;;  %v2840_v1 = vmov 0.0  }
 0x433   :  { %1820 = vperm.xlu1 %2537, %v1672_v5   ;;  %1815 = vperm.xlu0 %2538, %v1671_v44   ;;  %v1687_v16 = vmul.f32 %v2747_v7, %v3581_v45  ;;  %v1686_v2 = vmul.f32 %v2747_v7, %v3560_v28  ;;  %v2749_v21 = vpop.eup %2748  ;;  %v2571_v28 = vld [vmem:[%s3964_s8 + $0x8] sm:$0xff]   ;;  %v1698_v5 = vunpack.c.h.bf16 %v2777_v60  ;;  %v1697_v44 = vunpack.c.l.bf16 %v2777_v60 }
 0x434   :  { %v1690_v27 = vmul.f32 %v2749_v21, %v3975_v36  ;;  %v1689_v47 = vmul.f32 %v2749_v21, %v3976_v38  ;;  %2507 = vmatprep.subr.bf16.mxu0 %v2840_v1  ;;  %2511 = vmatprep.mubr.msk.bf16.mxu0 %vm2841_vm11, %v2840_v1  ;;  %v2780_v21 = vld [vmem:[%s3957_s1 + $0x30] sm:$0xff]   ;;  %v2781_v38 = vld [vmem:[%s3957_s1 + $0x38] sm:$0xff]  }
 0x435   :  { %2508 = vmatpush3.bf16.msra.mxu0 %v2570_v62  ;;  %v1704_v36 = vunpack.c.h.bf16 %v2780_v21 }
 0x436   :  { %2509 = vmatprep.subr.bf16.mxu0 %v2840_v1 }
 0x437   :  { %1830 = vperm.xlu1 %2537, %v1675_v56   ;;  %1825 = vperm.xlu0 %2538, %v1674_v52  }
 0x439   :  { %2510 = vmatpush3.bf16.msra.mxu0 %v2571_v28 }
 0x43a   :  { %2515 = vmatprep.subr.bf16.mxu0 %v2840_v1 }
 0x43b   :  { %1840 = vperm.xlu1 %2537, %v1678_v32   ;;  %1835 = vperm.xlu0 %2538, %v1677_v31  }
 0x43f   :  { %1850 = vperm.xlu1 %2537, %v1681_v4   ;;  %1845 = vperm.xlu0 %2538, %v1680_v15   ;;  %v2778_v15 = vld [vmem:[%s3957_s1 + $0x20] sm:$0xff]  }
 0x440   :  { %v1700_v58 = vunpack.c.h.bf16 %v2778_v15 }
 0x443   :  { %1860 = vperm.xlu1 %2537, %v1684_v48   ;;  %1855 = vperm.xlu0 %2538, %v1683_v34   ;;  %v1699_v48 = vunpack.c.l.bf16 %v2778_v15  ;;  %v2779_v34 = vld [vmem:[%s3957_s1 + $0x28] sm:$0xff]  }
 0x444   :  { %v1702_v7 = vunpack.c.h.bf16 %v2779_v34 }
 0x447   :  { %1870 = vperm.xlu1 %2537, %v1687_v16   ;;  %1865 = vperm.xlu0 %2538, %v1686_v2   ;;  %v1701_v16 = vunpack.c.l.bf16 %v2779_v34 }
 0x44b   :  { %1880 = vperm.xlu1 %2537, %v1690_v27   ;;  %1875 = vperm.xlu0 %2538, %v1689_v47   ;;  %v1703_v27 = vunpack.c.l.bf16 %v2780_v21  ;;  %v1706_v47 = vunpack.c.h.bf16 %v2781_v38 }
 0x486   :  { %v1731_v45 = vpop.permute.xlu1 %1730  ;;  %v1726_v20 = vpop.permute.xlu0 %1725 }
 0x487   :  { %v1884_v33 = vmul.f32 %v1731_v45, %v1692_v61  ;;  %v1883_v46 = vmul.f32 %v1726_v20, %v1691_v14  ;;  %v1705_v45 = vunpack.c.l.bf16 %v2781_v38  ;;  %v2782_v20 = vld [vmem:[%s3957_s1 + $0x40] sm:$0xff]  }
 0x489   :  { %v1916_v25 = vsel %vm294_vm0, %v1884_v33, 0.0  ;;  %v1915_v18 = vsel %vm294_vm0, %v1883_v46, 0.0 }
 0x48a   :  { %v1741_v50 = vpop.permute.xlu1 %1740  ;;  %v1736_v11 = vpop.permute.xlu0 %1735  ;;  %v1917_v42 = vadd.f32 %v1916_v25, %v1915_v18 }
 0x48b   :  { %v1886_v40 = vmul.f32 %v1741_v50, %v1694_v54  ;;  %v1885_v53 = vmul.f32 %v1736_v11, %v1693_v12  ;;  %v1708_v50 = vunpack.c.h.bf16 %v2782_v20  ;;  %v3766_v54 = vld [vmem:[%s3957_s1 + $0x58] sm:$0xff]  }
 0x48c   :  { %v1918_v17 = vrot.slane %v1917_v42, 4  ;;  %v1714_v12 = vunpack.c.h.bf16 %v3766_v54 }
 0x48d   :  { %v1925_v29 = vsel %vm294_vm0, %v1886_v40, 0.0  ;;  %v1924_v8 = vsel %vm294_vm0, %v1885_v53, 0.0  ;;  %v1713_v40 = vunpack.c.l.bf16 %v3766_v54  ;;  %v3773_v53 = vld [vmem:[%s3957_s1 + $0x60] sm:$0xff]  }
 0x48e   :  { %v1751_v0 = vpop.permute.xlu1 %1750  ;;  %v1746_v19 = vpop.permute.xlu0 %1745  ;;  %v1926_v57 = vadd.f32 %v1925_v29, %v1924_v8  ;;  %v1919_v39 = vadd.f32 %v1918_v17, %v1917_v42  ;;  %v1716_v42 = vunpack.c.h.bf16 %v3773_v53  ;;  %v1715_v55 = vunpack.c.l.bf16 %v3773_v53 }
 0x48f   :  { %v1888_v43 = vmul.f32 %v1751_v0, %v1696_v41  ;;  %v1887_v30 = vmul.f32 %v1746_v19, %v1695_v49  ;;  %v1707_v0 = vunpack.c.l.bf16 %v2782_v20  ;;  %v2783_v19 = vld [vmem:[%s3957_s1 + $0x48] sm:$0xff]  }
 0x490   :  { %v1927_v6 = vrot.slane %v1926_v57, 4  ;;  %v1920_v52 = vrot.slane %v1919_v39, 2  ;;  %v1710_v33 = vunpack.c.h.bf16 %v2783_v19  ;;  %v1709_v46 = vunpack.c.l.bf16 %v2783_v19  ;;  %v3780_v41 = vld [vmem:[%s3957_s1 + $0x68] sm:$0xff]  }
 0x491   :  { %v1934_v51 = vsel %vm294_vm0, %v1888_v43, 0.0  ;;  %v1933_v56 = vsel %vm294_vm0, %v1887_v30, 0.0  ;;  %v1718_v49 = vunpack.c.h.bf16 %v3780_v41 }
 0x492   :  { %v1761_v13 = vpop.permute.xlu1 %1760  ;;  %v1756_v9 = vpop.permute.xlu0 %1755  ;;  %v1928_v3 = vadd.f32 %v1927_v6, %v1926_v57  ;;  %v1935_v4 = vadd.f32 %v1934_v51, %v1933_v56  ;;  %v1921_v2 = vadd.f32 %v1920_v52, %v1919_v39  ;;  %v1717_v39 = vunpack.c.l.bf16 %v3780_v41  ;;  %v3794_v6 = vld [vmem:[%s3957_s1 + $0x78] sm:$0xff]  }
 0x493   :  { %v1890_v32 = vmul.f32 %v1761_v13, %v1698_v5  ;;  %v1889_v31 = vmul.f32 %v1756_v9, %v1697_v44  ;;  %v3759_v13 = vld [vmem:[%s3957_s1 + $0x50] sm:$0xff]   ;;  %v1722_v51 = vunpack.c.h.bf16 %v3794_v6 }
 0x494   :  { %v1929_v11 = vrot.slane %v1928_v3, 2  ;;  %v1936_v23 = vrot.slane %v1935_v4, 4  ;;  %v1712_v9 = vunpack.c.h.bf16 %v3759_v13  ;;  %v1711_v22 = vunpack.c.l.bf16 %v3759_v13 }
 0x495   :  { %v1943_v62 = vsel %vm294_vm0, %v1890_v32, 0.0  ;;  %v1942_v28 = vsel %vm294_vm0, %v1889_v31, 0.0  ;;  %v1922_v25 = vrot.slane %v1921_v2, 1 }
 0x496   :  { %v1771_v26 = vpop.permute.xlu1 %1770  ;;  %v1766_v37 = vpop.permute.xlu0 %1765  ;;  %v1944_v18 = vadd.f32 %v1943_v62, %v1942_v28  ;;  %v1930_v17 = vadd.f32 %v1929_v11, %v1928_v3  ;;  %v1937_v57 = vadd.f32 %v1936_v23, %v1935_v4 }
 0x497   :  { %v1892_v29 = vmul.f32 %v1771_v26, %v1700_v58  ;;  %v1891_v8 = vmul.f32 %v1766_v37, %v1699_v48  ;;  %v3787_v26 = vld [vmem:[%s3957_s1 + $0x70] sm:$0xff]   ;;  %v1923_v56 = vadd.f32 %v1922_v25, %v1921_v2 }
 0x498   :  { %v1720_v37 = vunpack.c.h.bf16 %v3787_v26  ;;  %v1719_v44 = vunpack.c.l.bf16 %v3787_v26  ;;  %v1945_v52 = vrot.slane %v1944_v18, 4  ;;  %v1931_v48 = vrot.slane %v1930_v17, 1 }
 0x499   :  { %v1952_v3 = vsel %vm294_vm0, %v1892_v29, 0.0  ;;  %v1951_v4 = vsel %vm294_vm0, %v1891_v8, 0.0  ;;  %v1938_v34 = vrot.slane %v1937_v57, 2  ;;  %v2059_v19 = vpack.c.bf16 %v1923_v56, %v1923_v56 }
 0x49a   :  { %v3723_v10 = vpop.permute.xlu1 %1780  ;;  %v3725_v24 = vpop.permute.xlu0 %1775  ;;  %v1953_v20 = vadd.f32 %v1952_v3, %v1951_v4  ;;  %v1721_v8 = vunpack.c.l.bf16 %v3794_v6 }
 0x49b   :  { %v1894_v32 = vmul.f32 %v3723_v10, %v1702_v7  ;;  %v1893_v31 = vmul.f32 %v3725_v24, %v1701_v16  ;;  %v1946_v16 = vadd.f32 %v1945_v52, %v1944_v18 }
 0x49c   :  { %v1954_v52 = vrot.slane %v1953_v20, 4 }
 0x49d   :  { %v1947_v25 = vrot.slane %v1946_v16, 2 }
 0x49e   :  { %v3732_v59 = vpop.permute.xlu1 %1790  ;;  %v3734_v63 = vpop.permute.xlu0 %1785 }
 0x49f   :  { %v1896_v15 = vmul.f32 %v3732_v59, %v1704_v36  ;;  %v1895_v58 = vmul.f32 %v3734_v63, %v1703_v27  ;;  %v1960_v59 = vsel %vm294_vm0, %v1893_v31, 0.0 }
 0x4a1   :  { %v1970_v63 = vsel %vm294_vm0, %v1896_v15, 0.0  ;;  %v1969_v36 = vsel %vm294_vm0, %v1895_v58, 0.0  ;;  %v1948_v15 = vadd.f32 %v1947_v25, %v1946_v16 }
 0x4a2   :  { %v1801_v61 = vpop.permute.xlu1 %1800  ;;  %v1796_v14 = vpop.permute.xlu0 %1795  ;;  %v1971_v29 = vadd.f32 %v1970_v63, %v1969_v36 }
 0x4a3   :  { %v1898_v21 = vmul.f32 %v1801_v61, %v1706_v47  ;;  %v1897_v38 = vmul.f32 %v1796_v14, %v1705_v45  ;;  %v1949_v63 = vrot.slane %v1948_v15, 1 }
 0x4a5   :  { %v1979_v45 = vsel %vm294_vm0, %v1898_v21, 0.0  ;;  %v1978_v11 = vsel %vm294_vm0, %v1897_v38, 0.0  ;;  %v3838_v25 = vadd.f32 %v1949_v63, %v1948_v15 }
 0x4ae   :  { %v1811_v43 = vpop.permute.xlu1 %1810  ;;  %v1806_v30 = vpop.permute.xlu0 %1805 }
 0x4af   :  { %v1900_v60 = vmul.f32 %v1811_v43, %v1708_v50  ;;  %v1899_v5 = vmul.f32 %v1806_v30, %v1707_v0  ;;  %v1961_v50 = vsel %vm294_vm0, %v1894_v32, 0.0  ;;  %v1939_v43 = vadd.f32 %v1938_v34, %v1937_v57 }
 0x4b0   :  { %v1962_v18 = vadd.f32 %v1961_v50, %v1960_v59  ;;  %v1980_v30 = vadd.f32 %v1979_v45, %v1978_v11 }
 0x4b1   :  { %v1988_v2 = vsel %vm294_vm0, %v1900_v60, 0.0  ;;  %v1987_v10 = vsel %vm294_vm0, %v1899_v5, 0.0  ;;  %v1940_v21 = vrot.slane %v1939_v43, 1 }
 0x4b2   :  { %v1821_v62 = vpop.permute.xlu1 %1820  ;;  %v1816_v28 = vpop.permute.xlu0 %1815  ;;  %v1989_v23 = vadd.f32 %v1988_v2, %v1987_v10  ;;  %v1963_v58 = vrot.slane %v1962_v18, 4  ;;  %v1981_v38 = vrot.slane %v1980_v30, 4  ;;  %v1955_v2 = vadd.f32 %v1954_v52, %v1953_v20 }
 0x4b3   :  { %v1902_v7 = vmul.f32 %v1821_v62, %v1710_v33  ;;  %v1901_v24 = vmul.f32 %v1816_v28, %v1709_v46  ;;  %v1932_v33 = vadd.f32 %v1931_v48, %v1930_v17  ;;  %v3816_v17 = vunpack.c.l.b16 %v2059_v19 }
 0x4b4   :  { %v1990_v32 = vrot.slane %v1989_v23, 4  ;;  %v1972_v48 = vrot.slane %v1971_v29, 4  ;;  %v1964_v36 = vadd.f32 %v1963_v58, %v1962_v18  ;;  %v3830_v45 = vadd.f32 %v1940_v21, %v1939_v43 }
 0x4b5   :  { %v1997_v27 = vsel %vm294_vm0, %v1902_v7, 0.0  ;;  %v1996_v47 = vsel %vm294_vm0, %v1901_v24, 0.0  ;;  %v1982_v20 = vadd.f32 %v1981_v38, %v1980_v30 }
 0x4b6   :  { %v1998_v61 = vadd.f32 %v1997_v27, %v1996_v47  ;;  %v1831_v14 = vpop.permute.xlu1 %1830  ;;  %v1826_v0 = vpop.permute.xlu0 %1825  ;;  %v1991_v10 = vadd.f32 %v1990_v32, %v1989_v23  ;;  %v1973_v27 = vadd.f32 %v1972_v48, %v1971_v29  ;;  %v1965_v18 = vrot.slane %v1964_v36, 2 }
 0x4b7   :  { %v1904_v46 = vmul.f32 %v1831_v14, %v1712_v9  ;;  %v1903_v13 = vmul.f32 %v1826_v0, %v1711_v22  ;;  %v2060_v9 = vpack.c.bf16 %v1932_v33, %v1932_v33  ;;  %v1983_v30 = vrot.slane %v1982_v20, 2 }
 0x4b8   :  { %v1999_v31 = vrot.slane %v1998_v61, 4  ;;  %v1992_v14 = vrot.slane %v1991_v10, 2  ;;  %v1974_v29 = vrot.slane %v1973_v27, 2 }
 0x4b9   :  { %v2006_v60 = vsel %vm294_vm0, %v1904_v46, 0.0  ;;  %v2005_v5 = vsel %vm294_vm0, %v1903_v13, 0.0 }
 0x4ba   :  { %v2007_v3 = vadd.f32 %v2006_v60, %v2005_v5  ;;  %v1841_v4 = vpop.permute.xlu1 %1840  ;;  %v1836_v56 = vpop.permute.xlu0 %1835  ;;  %v2000_v7 = vadd.f32 %v1999_v31, %v1998_v61  ;;  %v1956_v61 = vrot.slane %v1955_v2, 2  ;;  %v1993_v31 = vadd.f32 %v1992_v14, %v1991_v10 }
 0x4bb   :  { %v1906_v22 = vmul.f32 %v1841_v4, %v1714_v12  ;;  %v1905_v57 = vmul.f32 %v1836_v56, %v1713_v40  ;;  %v3824_v12 = vunpack.c.l.b16 %v2060_v9  ;;  %v1975_v15 = vadd.f32 %v1974_v29, %v1973_v27 }
 0x4bc   :  { %v2008_v34 = vrot.slane %v2007_v3, 4  ;;  %v2001_v0 = vrot.slane %v2000_v7, 2  ;;  %v1957_v32 = vadd.f32 %v1956_v61, %v1955_v2 }
 0x4bd   :  { %v2015_v62 = vsel %vm294_vm0, %v1906_v22, 0.0  ;;  %v2014_v28 = vsel %vm294_vm0, %v1905_v57, 0.0  ;;  %v1966_v57 = vadd.f32 %v1965_v18, %v1964_v36 }
 0x4be   :  { %v2016_v24 = vadd.f32 %v2015_v62, %v2014_v28  ;;  %v1851_v50 = vpop.permute.xlu1 %1850  ;;  %v1846_v59 = vpop.permute.xlu0 %1845  ;;  %v2009_v54 = vadd.f32 %v2008_v34, %v2007_v3  ;;  %v2002_v3 = vadd.f32 %v2001_v0, %v2000_v7  ;;  %v1984_v34 = vadd.f32 %v1983_v30, %v1982_v20 }
 0x4bf   :  { %v1908_v40 = vmul.f32 %v1851_v50, %v1716_v42  ;;  %v1907_v16 = vmul.f32 %v1846_v59, %v1715_v55  ;;  %v1994_v28 = vrot.slane %v1993_v31, 1  ;;  %v1967_v36 = vrot.slane %v1966_v57, 1 }
 0x4c0   :  { %v2017_v47 = vrot.slane %v2016_v24, 4  ;;  %v2010_v46 = vrot.slane %v2009_v54, 2  ;;  %v2003_v2 = vrot.slane %v2002_v3, 1  ;;  %v1976_v0 = vrot.slane %v1975_v15, 1 }
 0x4c1   :  { %v2024_v11 = vsel %vm294_vm0, %v1908_v40, 0.0  ;;  %v2023_v23 = vsel %vm294_vm0, %v1907_v16, 0.0 }
 0x4c2   :  { %v2018_v19 = vadd.f32 %v2017_v47, %v2016_v24  ;;  %v1861_v33 = vpop.permute.xlu1 %1860  ;;  %v1856_v42 = vpop.permute.xlu0 %1855  ;;  %v2025_v53 = vadd.f32 %v2024_v11, %v2023_v23  ;;  %v2011_v9 = vadd.f32 %v2010_v46, %v2009_v54  ;;  %v1958_v54 = vrot.slane %v1957_v32, 1 }
 0x4c3   :  { %v1910_v55 = vmul.f32 %v1861_v33, %v1718_v49  ;;  %v1909_v13 = vmul.f32 %v1856_v42, %v1717_v39  ;;  %v2004_v11 = vadd.f32 %v2003_v2, %v2002_v3 }
 0x4c4   :  { %v2019_v43 = vrot.slane %v2018_v19, 2  ;;  %v2026_v60 = vrot.slane %v2025_v53, 4 }
 0x4c5   :  { %v2033_v5 = vsel %vm294_vm0, %v1910_v55, 0.0  ;;  %v2032_v52 = vsel %vm294_vm0, %v1909_v13, 0.0  ;;  %v1959_v55 = vadd.f32 %v1958_v54, %v1957_v32  ;;  %v1968_v13 = vadd.f32 %v1967_v36, %v1966_v57 }
 0x4c6   :  { %v2034_v4 = vadd.f32 %v2033_v5, %v2032_v52  ;;  %v1871_v56 = vpop.permute.xlu1 %1870  ;;  %v1866_v49 = vpop.permute.xlu0 %1865  ;;  %v2027_v41 = vadd.f32 %v2026_v60, %v2025_v53  ;;  %v2020_v58 = vadd.f32 %v2019_v43, %v2018_v19  ;;  %v1985_v19 = vrot.slane %v1984_v34, 1 }
 0x4c7   :  { %v1912_v39 = vmul.f32 %v1871_v56, %v1720_v37  ;;  %v1911_v22 = vmul.f32 %v1866_v49, %v1719_v44  ;;  %v2012_v37 = vrot.slane %v2011_v9, 1  ;;  %v2061_v53 = vpack.c.bf16 %v3830_v45, %v3830_v45 }
 0x4c8   :  { %v2035_v48 = vrot.slane %v2034_v4, 4  ;;  %v2028_v21 = vrot.slane %v2027_v41, 2  ;;  %v2021_v40 = vrot.slane %v2020_v58, 1  ;;  %v2068_v29 = vpack.c.bf16 %v2004_v11, %v2004_v11 }
 0x4c9   :  { %v2042_v38 = vsel %vm294_vm0, %v1912_v39, 0.0  ;;  %v2041_v62 = vsel %vm294_vm0, %v1911_v22, 0.0  ;;  %v2013_v33 = vadd.f32 %v2012_v37, %v2011_v9  ;;  %v2062_v5 = vpack.c.bf16 %v3838_v25, %v3838_v25 }
 0x4ca   :  { %v2036_v10 = vadd.f32 %v2035_v48, %v2034_v4  ;;  %v2043_v7 = vadd.f32 %v2042_v38, %v2041_v62  ;;  %v1881_v24 = vpop.permute.xlu1 %1880  ;;  %v1876_v50 = vpop.permute.xlu0 %1875  ;;  %v2029_v59 = vadd.f32 %v2028_v21, %v2027_v41  ;;  %v2022_v6 = vadd.f32 %v2021_v40, %v2020_v58 }
 0x4cb   :  { %v1914_v26 = vmul.f32 %v1881_v24, %v1722_v51  ;;  %v1913_v44 = vmul.f32 %v1876_v50, %v1721_v8  ;;  %v1995_v51 = vadd.f32 %v1994_v28, %v1993_v31  ;;  %v1977_v52 = vadd.f32 %v1976_v0, %v1975_v15 }
 0x4cc   :  { %v2037_v16 = vrot.slane %v2036_v10, 2  ;;  %v2044_v63 = vrot.slane %v2043_v7, 4  ;;  %v2030_v27 = vrot.slane %v2029_v59, 1  ;;  %v1986_v31 = vadd.f32 %v1985_v19, %v1984_v34 }
 0x4cd   :  { %v2051_v47 = vsel %vm294_vm0, %v1914_v26, 0.0  ;;  %v2050_v20 = vsel %vm294_vm0, %v1913_v44, 0.0  ;;  %v2069_v3 = vpack.c.bf16 %v2013_v33, %v2013_v33  ;;  %v2067_v4 = vpack.c.bf16 %v1995_v51, %v1995_v51  ;;  %v2790_v33 = vld [vmem:[%s3960_s4] sm:$0x3] }
 0x4ce   :  { %v2038_v23 = vadd.f32 %v2037_v16, %v2036_v10  ;;  %v2045_v61 = vadd.f32 %v2044_v63, %v2043_v7  ;;  %v2052_v14 = vadd.f32 %v2051_v47, %v2050_v20  ;;  %v2031_v18 = vadd.f32 %v2030_v27, %v2029_v59 }
 0x4cf   :  { %v2070_v56 = vpack.c.bf16 %v2022_v6, %v2022_v6  ;;  %v2097_v41 = vunpack.c.l.b16 %v2061_v53  ;;  %v2063_v39 = vpack.c.bf16 %v1959_v55, %v1959_v55  ;;  %v2064_v45 = vpack.c.bf16 %v1968_v13, %v1968_v13  ;;  %v3978_v53 = vld [vmem:[#allocation9_spill] sm:$0xff] }
 0x4d0   :  { %v2039_v8 = vrot.slane %v2038_v23, 1  ;;  %v2046_v42 = vrot.slane %v2045_v61, 2  ;;  %v2053_v46 = vrot.slane %v2052_v14, 4  ;;  %v2071_v32 = vpack.c.bf16 %v2031_v18, %v2031_v18 }
 0x4d1   :  { %v2104_v22 = vunpack.c.l.b16 %v2068_v29  ;;  %v2098_v21 = vunpack.c.l.b16 %v2062_v5  ;;  %v2065_v38 = vpack.c.bf16 %v1977_v52, %v1977_v52  ;;  %v2066_v62 = vpack.c.bf16 %v1986_v31, %v1986_v31  ;;  %v44_v52 = vld [vmem:[%s3958_s2 + $0x8] sm:$0xff] }
 0x4d2   :  { %v2040_v43 = vadd.f32 %v2039_v8, %v2038_v23  ;;  %v2047_v30 = vadd.f32 %v2046_v42, %v2045_v61  ;;  %v2054_v60 = vadd.f32 %v2053_v46, %v2052_v14  ;;  %v2105_v28 = vunpack.c.l.b16 %v2069_v3  ;;  %v3977_v8 = vld [vmem:[#allocation8_spill] sm:$0xff] }
 0x4d3   :  { %v2103_v25 = vunpack.c.l.b16 %v2067_v4  ;;  %v2106_v15 = vunpack.c.l.b16 %v2070_v56  ;;  %v2111_v10 = vsel %vm1060_vm4, %v3824_v12, %v3816_v17  ;;  %v2099_v7 = vunpack.c.l.b16 %v2063_v39 }
 0x4d4   :  { %v2048_v49 = vrot.slane %v2047_v30, 1  ;;  %v2055_v9 = vrot.slane %v2054_v60, 2  ;;  %v2072_v57 = vpack.c.bf16 %v2040_v43, %v2040_v43  ;;  %v2107_v24 = vunpack.c.l.b16 %v2071_v32 }
 0x4d5   :  { %v2100_v50 = vunpack.c.l.b16 %v2064_v45  ;;  %v2118_v37 = vsel %vm1060_vm4, %v2104_v22, %v2103_v25  ;;  %v2112_v44 = vsel %vm1062_vm5, %v2097_v41, %v2111_v10  ;;  %v2101_v54 = vunpack.c.l.b16 %v2065_v38 }
 0x4d6   :  { %v2049_v58 = vadd.f32 %v2048_v49, %v2047_v30  ;;  %v2056_v48 = vadd.f32 %v2055_v9, %v2054_v60  ;;  %v2108_v59 = vunpack.c.l.b16 %v2072_v57  ;;  %v2119_v40 = vsel %vm1062_vm5, %v2105_v28, %v2118_v37 }
 0x4d7   :  { %v2113_v63 = vsel %vm1064_vm6, %v2098_v21, %v2112_v44  ;;  %v2102_v36 = vunpack.c.l.b16 %v2066_v62  ;;  %v2120_v27 = vsel %vm1064_vm6, %v2106_v15, %v2119_v40  ;;  %v60_v6 = vrot.slane %v2790_v33, %v3024_v35  ;;  %v43_v35 = vld [vmem:[%s3958_s2] sm:$0xff] }
 0x4d8   :  { %v2073_v34 = vpack.c.bf16 %v2049_v58, %v2049_v58  ;;  %v2057_v2 = vrot.slane %v2056_v48, 1  ;;  %v2114_v17 = vsel %vm1066_vm7, %v2099_v7, %v2113_v63  ;;  %v2121_v12 = vsel %vm1066_vm7, %v2107_v24, %v2120_v27 }
 0x4d9   :  { %v2115_v20 = vsel %vm1068_vm8, %v2100_v50, %v2114_v17  ;;  %v2122_v11 = vsel %vm1068_vm8, %v2108_v59, %v2121_v12  ;;  %v151_v42 = vadd.f32 %v3977_v8, %v60_v6  ;;  %v155_v55 = vadd.f32 %v3978_v53, %v60_v6 }
 0x4da   :  { %v2058_v26 = vadd.f32 %v2057_v2, %v2056_v48  ;;  %v2109_v16 = vunpack.c.l.b16 %v2073_v34  ;;  %v2116_v61 = vsel %vm1070_vm9, %v2101_v54, %v2115_v20  ;;  %v2572_v34 = vld [vmem:[%s3965_s9] sm:$0xff]   ;;  %v2573_v2 = vld [vmem:[%s3965_s9 + $0x8] sm:$0xff]  }
 0x4db   :  { %v2117_v0 = vsel %vm1072_vm10, %v2102_v36, %v2116_v61 }
 0x4dc   :  { %v2074_v47 = vpack.c.bf16 %v2058_v26, %v2058_v26  ;;  %v2123_v14 = vsel %vm1070_vm9, %v2109_v16, %v2122_v11 }
 0x4de   :  { %v2110_v23 = vunpack.c.l.b16 %v2074_v47 }
 0x4e0   :  { %v2124_v19 = vsel %vm1072_vm10, %v2110_v23, %v2123_v14 }
 0x4e1   :  { %v2125_v51 = vpack.c.b16 %v2124_v19, %v2117_v0 }
 0x4e3   :  { %2512 = vmatmul.mubr.msk.bf16.vlgmr.msra.gmra.mrb[12].mxu0 %vm294_vm0, %v2125_v51 }
 0x4e4   :  { %2519 = vmatprep.mubr.msk.bf16.mxu0 %vm2841_vm11, %v2840_v1  ;;  %2516 = vmatpush3.bf16.msra.mxu0 %v2572_v34 }
 0x4e5   :  { %2517 = vmatprep.subr.bf16.mxu0 %v2840_v1  ;;  %v2443_v1 = vld [vmem:[%s3966_s10] ss:$0 sm:$0xff]  ;;  %s2845_s10 = smov [#allocation2]  }
 0x4e6   :  { %s2365_s19 = sshll.u32 %s2845_s10, 4  ;;  %s2366_s19 = int_to_ptr.vmem [resolvable:$true] %s2365_s19 }
 0x4e7   :  { %s2791_s7 = scalar_lea.vmem %s2366_s19, 256  ;;  %p2796_p1 = scmp.lt.s32.totalorder %s2366_s19, %s2366_s19 }
 0x4e8   :  { %2518 = vmatpush3.bf16.msra.mxu0 %v2573_v2  ;;  %p2792_p0 = scmp.ne.s32.totalorder %s2366_s19, %s2791_s7  ;;  %p2797_p2 = scmp.lt.s32.totalorder %s2791_s7, %s2791_s7 }
 0x4ea   :  { %p2798_p3 = por %p2797_p2, %p2796_p1 }
 0x4ec   :  { %p2799_p4 = pnand %p2798_p3, %p2792_p0 }
 0x5b6   :  { %v2175_v46 = vpop.f32.mrb[12].mxu0 }
 0x5b7   :  { %v2182_v13 = vadd.f32 %v2175_v46, %v151_v42  ;;  %v2513_v18 = vpop.f32.mrb[13].mxu0 }
 0x5b8   :  { %v2178_v29 = vpop.f32.mrb[14].mxu0 }
 0x5b9   :  { %2750 = vtanh.f32 %v2182_v13  ;;  %v2183_v43 = vadd.f32 %v2178_v29, %v155_v55  ;;  %v2514_v30 = vpop.f32.mrb[15].mxu0  ;;  %v2441_v31 = vmul.f32 -1.442695, %v2182_v13 }
 0x5bb   :  { %2752 = vtanh.f32 %v2183_v43  ;;  %v2442_v3 = vmul.f32 -1.442695, %v2183_v43 }
 0x5bc   :  { %2754 = vpow2.f32 %v2441_v31 }
 0x5bd   :  { %2756 = vpow2.f32 %v2442_v3 }
 0x5c3   :  { %v2751_v60 = vpop.eup %2750 }
 0x5c4   :  { %2210 = vrot.lane.b32.xlu0 %v2751_v60, %s2842_s30 }
 0x5c5   :  { %v2753_v5 = vpop.eup %2752 }
 0x5c6   :  { %2212 = vrot.lane.b32.xlu1 %v2753_v5, %s2842_s30  ;;  %v2755_v4 = vpop.eup %2754 }
 0x5c7   :  { %v2757_v56 = vpop.eup %2756  ;;  %v2190_v49 = vadd.f32 1.0, %v2755_v4 }
 0x5c8   :  { %2200 = vrot.lane.b32.xlu0 %v43_v35, %s2842_s30  ;;  %v2191_v9 = vadd.f32 1.0, %v2757_v56 }
 0x5c9   :  { %2758 = vrcp.f32 %v2190_v49 }
 0x5ca   :  { %2202 = vrot.lane.b32.xlu1 %v44_v52, %s2842_s30  ;;  %2760 = vrcp.f32 %v2191_v9 }
 0x5d3   :  { %v2759_v41 = vpop.eup %2758 }
 0x5d4   :  { %v2761_v32 = vpop.eup %2760 }
 0x636   :  { %v2211_v39 = vpop.permute.xlu0 %2210 }
 0x637   :  { %v2216_v45 = vmul.f32 %v2759_v41, %v2211_v39 }
 0x638   :  { %v2213_v22 = vpop.permute.xlu1 %2212 }
 0x639   :  { %2220 = vrot.lane.b32.xlu0 %v2216_v45, %s2842_s30  ;;  %v2217_v57 = vmul.f32 %v2761_v32, %v2213_v22 }
 0x63a   :  { %v2201_v58 = vpop.permute.xlu0 %2200 }
 0x63b   :  { %2222 = vrot.lane.b32.xlu1 %v2217_v57, %s2842_s30  ;;  %v2206_v48 = vmul.f32 %v2759_v41, %v2201_v58 }
 0x63c   :  { %v2203_v21 = vpop.permute.xlu1 %2202 }
 0x63d   :  { %v2207_v28 = vmul.f32 %v2761_v32, %v2203_v21 }
 0x6ab   :  { %v2221_v38 = vpop.permute.xlu0 %2220 }
 0x6ac   :  { %v2226_v62 = vadd.f32 %v2221_v38, %v2206_v48 }
 0x6ad   :  { %v2223_v25 = vpop.permute.xlu1 %2222 }
 0x6ae   :  { %2762 = vtanh.f32 %v2226_v62  ;;  %v2227_v15 = vadd.f32 %v2223_v25, %v2207_v28 }
 0x6b0   :  { %2764 = vtanh.f32 %v2227_v15 }
 0x6b8   :  { %v2763_v10 = vpop.eup %2762 }
 0x6b9   :  { %2232 = vrot.lane.b32.xlu0 %v2763_v10, %s2842_s30 }
 0x6ba   :  { %v2765_v7 = vpop.eup %2764 }
 0x6bb   :  { %2234 = vrot.lane.b32.xlu1 %v2765_v7, %s2842_s30 }
 0x72b   :  { %v2233_v24 = vpop.permute.xlu0 %2232 }
 0x72c   :  { %v2238_v37 = vmul.f32 %v2759_v41, %v2233_v24 }
 0x72d   :  { %v2235_v50 = vpop.permute.xlu1 %2234 }
 0x72e   :  { %v2239_v59 = vmul.f32 %v2761_v32, %v2235_v50 }
 0x730   :  { %v2240_v26 = vpack.c.bf16 %v2239_v59, %v2238_v37 }
 0x732   :  { %2253 = vrot.lane.b32.xlu0 %v2240_v26, %s2843_s17 }
 0x7a4   :  { %v2254_v44 = vpop.permute.xlu0 %2253 }
 0x7a5   :  { %2520 = vmatmul.mubr.msk.bf16.vlgmr.msra.gmra.mrb[16].mxu0 %vm294_vm0, %v2254_v44 }
 0x878   :  { %v2304_v54 = vpop.f32.mrb[16].mxu0 }
 0x879   :  { %v3908_v40 = vadd.f32 %v2443_v1, %v2304_v54  ;;  %v2521_v16 = vpop.f32.mrb[17].mxu0 }
 0x87a   :  { %v2307_v63 = vpop.f32.mrb[18].mxu0 }
 0x87b   :  { %v3910_v36 = vadd.f32 %v2443_v1, %v2307_v63  ;;  %v2522_v27 = vpop.f32.mrb[19].mxu0  ;;  %v2311_v47 = vsel %vm294_vm0, %v3908_v40, -inf }
 0x87c   :  { %2312 = vmax.xlane.f32.xlu1 %v2311_v47 }
 0x87d   :  { %v2314_v17 = vsel %vm294_vm0, %v3910_v36, -inf }
 0x87e   :  { %2315 = vmax.xlane.f32.xlu0 %v2314_v17 }
 0x88d   :  { %2341 = vrot.lane.b32.xlu1 %v2227_v15, %s2844_s6 }
 0x894   :  { %2339 = vrot.lane.b32.xlu0 %v2226_v62, %s2844_s6 }
 0x909   :  { %v2313_v12 = vpop.xlane.xlu1 %2312 }
 0x90a   :  { %v2317_v20 = vsub.f32 %v3908_v40, %v2313_v12 }
 0x90b   :  { %v2316_v11 = vpop.xlane.xlu0 %2315 }
 0x90c   :  { %v2319_v23 = vmul.f32 1.442695, %v2317_v20  ;;  %v2318_v61 = vsub.f32 %v3910_v36, %v2316_v11 }
 0x90d   :  { %v2342_v14 = vpop.permute.xlu1 %2341 }
 0x90e   :  { %2766 = vpow2.f32 %v2319_v23  ;;  %v2321_v0 = vmul.f32 1.442695, %v2318_v61  ;;  %2346 = vst.msk [vmem:[#allocation2 + $0x8] sm:$0xff] %vm294_vm0, %v2342_v14 }
 0x90f   :  { %v2340_v19 = vpop.permute.xlu0 %2339 }
 0x910   :  { %2768 = vpow2.f32 %v2321_v0  ;;  %2345 = vst.msk [vmem:[#allocation2] sm:$0xff] %vm294_vm0, %v2340_v19 }
 0x918   :  { %v2767_v51 = vpop.eup %2766 }
 0x919   :  { %v2323_v33 = vsel %vm294_vm0, %v2767_v51, 0.0 }
 0x91a   :  { %v2769_v6 = vpop.eup %2768  ;;  %2324 = vadd.xlane.f32.xlu0 %v2323_v33 }
 0x91b   :  { %v2326_v8 = vsel %vm294_vm0, %v2769_v6, 0.0 }
 0x91c   :  { %2327 = vadd.xlane.f32.xlu1 %v2326_v8 }
 0x92d   :  { %2349 = vrot.lane.b32.xlu1 %v2238_v37, %s2844_s6 }
 0x930   :  { %2351 = vrot.lane.b32.xlu0 %v2239_v59, %s2844_s6 }
 0x9a7   :  { %v2325_v42 = vpop.xlane.xlu0 %2324 }
 0x9a8   :  { %2770 = vlog2.f32 %v2325_v42 }
 0x9a9   :  { %v2328_v46 = vpop.xlane.xlu1 %2327 }
 0x9aa   :  { %2772 = vlog2.f32 %v2328_v46 }
 0x9ab   :  { %v2352_v53 = vpop.permute.xlu0 %2351 }
 0x9ac   :  { %2357 = vst.msk [vmem:[#allocation2 + $0x8] sm:$0xff] %vm2355_vm12, %v2352_v53 }
 0x9ad   :  { %v2350_v55 = vpop.permute.xlu1 %2349 }
 0x9ae   :  { %2356 = vst.msk [vmem:[#allocation2] sm:$0xff] %vm2355_vm12, %v2350_v55 }
 0x9af   :  { %2802 = shalt.err (!%p2799_p4)
}
 0x9b0   :  { %s2803_s22 = scalar_lea.hbm %s3967_s11, 256 }
 0x9b1   :  { %p2804_p5 = scmp.ne.s32.totalorder %s3967_s11, %s2803_s22  ;;  %p2807_p6 = scmp.lt.u32.totalorder %s2803_s22, %s3967_s11 }
 0x9b3   :  { %p2809_p7 = pnand %p2807_p6, %p2804_p5 }
 0x9b5   :  { %2812 = shalt.err (!%p2809_p7)
}
 0x9b6   :  { %s2846_s26 = smov 128   ;;  %s2847_s27 = smov 8   ;;  %v2771_v13 = vpop.eup %2770 }
 0x9b7   :  { %2371 = dma.vmem_to_hbm [thread:$0]  %s2366_s19, 256, %s3967_s11, [#allocation3], %s2846_s26, %s2846_s26, %s2847_s27   ;;  %v2330_v18 = vmul.f32 0.6931472, %v2771_v13  ;;  %v2773_v29 = vpop.eup %2772 }
 0x9b8   :  { %v2332_v30 = vmul.f32 0.6931472, %v2773_v29  ;;  %s2848_s1 = smov [#allocation4]  }
 0x9b9   :  { %v2333_v43 = vadd.f32 %v2330_v18, %v2313_v12  ;;  %s2377_s29 = sshll.u32 %s2848_s1, 4  ;;  %s2378_s29 = int_to_ptr.vmem [resolvable:$true] %s2377_s29 }
 0x9ba   :  { %v2334_v35 = vadd.f32 %v2332_v30, %v2316_v11  ;;  %s2813_s30 = scalar_lea.vmem %s2378_s29, 256  ;;  %p2818_p9 = scmp.lt.s32.totalorder %s2378_s29, %s2378_s29 }
 0x9bb   :  { %v2335_v60 = vsub.f32 %v3908_v40, %v2333_v43  ;;  %p2814_p8 = scmp.ne.s32.totalorder %s2378_s29, %s2813_s30  ;;  %p2819_p10 = scmp.lt.s32.totalorder %s2813_s30, %s2813_s30 }
 0x9bc   :  { %v2336_v5 = vsub.f32 %v3910_v36, %v2334_v35 }
 0x9bd   :  { %2358 = vst.msk [vmem:[#allocation4] sm:$0xff] %vm294_vm0, %v2335_v60  ;;  %p2820_p11 = por %p2819_p10, %p2818_p9 }
 0x9be   :  { %2359 = vst.msk [vmem:[#allocation4 + $0x8] sm:$0xff] %vm294_vm0, %v2336_v5 }
 0x9bf   :  { %p2821_p12 = pnand %p2820_p11, %p2814_p8 }
 0x9c1   :  { %2824 = shalt.err (!%p2821_p12)
}
 0x9c2   :  { %s2825_s4 = scalar_lea.hbm %s3968_s12, 256 }
 0x9c3   :  { %p2826_p13 = scmp.ne.s32.totalorder %s3968_s12, %s2825_s4  ;;  %p2829_p0 = scmp.lt.u32.totalorder %s2825_s4, %s3968_s12 }
 0x9c5   :  { %p2831_p1 = pnand %p2829_p0, %p2826_p13 }
 0x9c7   :  { %2834 = shalt.err (!%p2831_p1)
}
 0x9c8   :  { %2383 = dma.vmem_to_hbm [thread:$0]  %s2378_s29, 256, %s3968_s12, [#allocation5], %s2846_s26, %s2846_s26, %s2847_s27  }
 0x9c9   :  { %2835 = dma.done.wait [#allocation3], 256  }
 0x9ca   :  { %2836 = vsyncadd [#allocation3], 4294967040 }
 0x9cb   :  { %2837 = dma.done.wait [#allocation5], 256  }
 0x9cc   :  { %2838 = vsyncadd [#allocation5], 4294967040 }
 0x9cd   :  { %2390 = vsyncpa [#allocation3], 1 }
 0x9ce   :  { %2391 = vsyncpa [#allocation5], 1 }

</bundles_post_ra>
